<compile_context>
chip_gen: v5e
topology: v5e:2x2
jax: 0.10.0
libtpu: 0.0.40
codegen_flags: <defaults>
</compile_context>

<pallas_src>
import jax
import jax.numpy as jnp
from jax.experimental import pallas as pl
from jax.experimental.pallas import tpu as pltpu

LANE = 128
SUBLANE = 8


def _round_up(x, m):
    return ((x + m - 1) // m) * m


def ms_cam_kernel(x_ref, xg_ref, wl1_ref, bl1_ref, wl2_ref, bl2_ref, o_ref):
    """One (1, T, Cp) tile of one batch element.

    Local branch: x @ wl1 + bl1 -> ReLU -> @ wl2 + bl2 (BN folded).
    Global branch xg is precomputed outside and broadcast over the tile.
    """
    x = x_ref[0]                                              # (T, Cp), I/O dtype
    h = jnp.dot(x, wl1_ref[...], preferred_element_type=jnp.float32)
    h = jnp.maximum(h + bl1_ref[...], 0.0)                    # (T, Cip), f32
    xl = jnp.dot(h.astype(wl2_ref.dtype), wl2_ref[...],
                 preferred_element_type=jnp.float32) + bl2_ref[...]   # (T, Cp), f32
    wei = jax.nn.sigmoid(xl + xg_ref[0])                      # (1, Cp) broadcasts
    o_ref[0] = (x.astype(jnp.float32) * wei).astype(o_ref.dtype)


def ms_cam_pallas(x_nchw, params, *, tile_rows=512):
    """MS_CAM forward.  x_nchw: (N, C, H, W).  Returns (N, C, H, W)."""
    (wl1, bl1, wl2, bl2, wg1, bg1, wg2, bg2) = params
    N, C, H, W = x_nchw.shape
    HW = H * W
    Ci = wl1.shape[1]
    dtype = x_nchw.dtype

    # NCHW -> channels-last, spatially flattened (N, HW, C)
    xf = x_nchw.transpose(0, 2, 3, 1).reshape(N, HW, C)

    # ---- global branch (GAP + two tiny matmuls) in plain JAX, f32 ----
    xm = jnp.mean(xf.astype(jnp.float32), axis=1, keepdims=True)     # (N, 1, C)
    hg = jnp.maximum(xm @ wg1 + bg1, 0.0)
    xg = hg @ wg2 + bg2                                              # (N, 1, C) f32

    # ---- zero-pad channel dims to 128-lane multiples (numerically exact) ----
    Cp = _round_up(C, LANE)
    Cip = _round_up(Ci, LANE)

    def pad2(a, rows, cols):
        return jnp.pad(a, ((0, rows - a.shape[0]), (0, cols - a.shape[1])))

    wl1_p = pad2(wl1, Cp, Cip).astype(dtype)     # matmul operands in I/O dtype
    bl1_p = pad2(bl1, 1, Cip)                    # biases stay f32
    wl2_p = pad2(wl2, Cip, Cp).astype(dtype)
    bl2_p = pad2(bl2, 1, Cp)
    xg_p = jnp.pad(xg, ((0, 0), (0, 0), (0, Cp - C)))                # f32

    # ---- tile the HW axis; pad HW to a multiple of the tile size ----
    T = min(tile_rows, _round_up(HW, SUBLANE))
    T = max(SUBLANE, (T // SUBLANE) * SUBLANE)
    HWp = _round_up(HW, T)
    xp = jnp.pad(xf, ((0, 0), (0, HWp - HW), (0, Cp - C)))

    grid = (N, HWp // T)
    wspec = lambda shape: pl.BlockSpec(shape, lambda n, t: (0, 0))

    out = pl.pallas_call(
        ms_cam_kernel,
        out_shape=jax.ShapeDtypeStruct((N, HWp, Cp), dtype),
        grid_spec=pltpu.PrefetchScalarGridSpec(
            num_scalar_prefetch=0,
            grid=grid,
            in_specs=[
                pl.BlockSpec((1, T, Cp), lambda n, t: (n, t, 0)),    # x tile
                pl.BlockSpec((1, 1, Cp), lambda n, t: (n, 0, 0)),    # xg (per-image)
                wspec((Cp, Cip)), wspec((1, Cip)),                   # local layer 1
                wspec((Cip, Cp)), wspec((1, Cp)),                    # local layer 2
            ],
            out_specs=pl.BlockSpec((1, T, Cp), lambda n, t: (n, t, 0)),
        ),
        compiler_params=pltpu.CompilerParams(
            dimension_semantics=("parallel", "parallel"),
            vmem_limit_bytes=32 * 1024 * 1024),
    )(xp, xg_p, wl1_p, bl1_p, wl2_p, bl2_p)

    # strip padding, back to NCHW
    return out[:, :HW, :C].reshape(N, H, W, C).transpose(0, 3, 1, 2)


def fold_bn(w, b, gamma, beta, mean, var, eps=1e-5):
    """Fold an eval-mode BatchNorm into a preceding 1x1 conv.
    w: (Cin, Cout) matmul weight, b: (Cout,) conv bias."""
    scale = gamma / jnp.sqrt(var + eps)
    w_f = w * scale[None, :]
    b_f = (b - mean) * scale + beta
    return w_f, b_f[None, :]                                  # bias as (1, Cout)


def make_params(key, channels, r):
    inter = channels // r
    ks = jax.random.split(key, 16)

    def conv_w(k, cin, cout):
        # PyTorch Conv2d 1x1 weight (cout, cin, 1, 1) -> matmul layout (cin, cout)
        return jax.random.normal(k, (cin, cout), jnp.float32) * 0.1

    def bn_params(k, c):
        k1, k2, k3 = jax.random.split(k, 3)
        gamma = 1.0 + 0.1 * jax.random.normal(k1, (c,), jnp.float32)
        beta = 0.05 * jax.random.normal(k2, (c,), jnp.float32)
        mean = 0.05 * jax.random.normal(k3, (c,), jnp.float32)
        var = jnp.ones((c,), jnp.float32)
        return gamma, beta, mean, var

    def branch(k_idx):
        w1 = conv_w(ks[k_idx + 0], channels, inter)
        b1 = 0.02 * jax.random.normal(ks[k_idx + 1], (inter,), jnp.float32)
        g1, be1, m1, v1 = bn_params(ks[k_idx + 2], inter)
        w2 = conv_w(ks[k_idx + 3], inter, channels)
        b2 = 0.02 * jax.random.normal(ks[k_idx + 4], (channels,), jnp.float32)
        g2, be2, m2, v2 = bn_params(ks[k_idx + 5], channels)
        w1f, b1f = fold_bn(w1, b1, g1, be1, m1, v1)
        w2f, b2f = fold_bn(w2, b2, g2, be2, m2, v2)
        return w1f, b1f, w2f, b2f

    wl1, bl1, wl2, bl2 = branch(0)     # local attention branch
    wg1, bg1, wg2, bg2 = branch(6)     # global attention branch
    return (wl1, bl1, wl2, bl2, wg1, bg1, wg2, bg2)


def ms_cam_reference(x_nchw, params):
    """Pure-JAX reference in the PyTorch NCHW convention (f32)."""
    (wl1, bl1, wl2, bl2, wg1, bg1, wg2, bg2) = params
    N, C, H, W = x_nchw.shape
    xf = x_nchw.astype(jnp.float32).transpose(0, 2, 3, 1).reshape(N, H * W, C)

    h = jnp.maximum(xf @ wl1 + bl1, 0.0)
    xl = h @ wl2 + bl2
    xm = jnp.mean(xf, axis=1, keepdims=True)
    hg = jnp.maximum(xm @ wg1 + bg1, 0.0)
    xg = hg @ wg2 + bg2
    wei = jax.nn.sigmoid(xl + xg)
    out = xf * wei
    return out.reshape(N, H, W, C).transpose(0, 3, 1, 2)


if __name__ == "__main__":
    channels, r = 64, 4
    N, H, W = 2, 16, 16

    key = jax.random.PRNGKey(0)
    kx, kp = jax.random.split(key)
    x = jax.random.normal(kx, (N, channels, H, W), jnp.float32)   # NCHW, like PyTorch
    params = make_params(kp, channels, r)

    ref = ms_cam_reference(x, params)

    # f32 path
    out = jax.block_until_ready(ms_cam_pallas(x, params))
    assert out.shape == (N, channels, H, W)
    assert jnp.allclose(out, ref, atol=1e-4, rtol=1e-4), "f32 mismatch vs reference"

    # bf16 I/O path (f32 accumulation inside): looser tolerance
    out_bf16 = jax.block_until_ready(ms_cam_pallas(x.astype(jnp.bfloat16), params))
    assert out_bf16.dtype == jnp.bfloat16
    assert jnp.allclose(out_bf16.astype(jnp.float32), ref, atol=5e-2, rtol=5e-2), \
        "bf16 mismatch vs reference"

    print("KERNEL_OK")
</pallas_src>

<mosaic_0001>
module attributes {stable_mosaic.version = 11 : i64} {
  func.func @ms_cam_kernel(%arg0: i32, %arg1: i32, %arg2: memref<1x256x128xf32, #tpu.memory_space<vmem>>, %arg3: memref<1x1x128xf32, #tpu.memory_space<vmem>>, %arg4: memref<128x128xf32, #tpu.memory_space<vmem>>, %arg5: memref<1x128xf32, #tpu.memory_space<vmem>>, %arg6: memref<128x128xf32, #tpu.memory_space<vmem>>, %arg7: memref<1x128xf32, #tpu.memory_space<vmem>>, %arg8: memref<1x256x128xf32, #tpu.memory_space<vmem>>) attributes {dimension_semantics = [#tpu.dimension_semantics<parallel>, #tpu.dimension_semantics<parallel>], iteration_bounds = array<i64: 2, 1>, scalar_prefetch = 0 : i64, scratch_operands = 0 : i64, tpu.core_type = #tpu.core_type<tc>, window_params = [{transform_indices = @transform_0, window_bounds = array<i64: 1, 256, 128>}, {transform_indices = @transform_1, window_bounds = array<i64: 1, 1, 128>}, {pipeline_mode = #tpu.pipeline_mode<synchronous>, transform_indices = @transform_2, window_bounds = array<i64: 128, 128>}, {pipeline_mode = #tpu.pipeline_mode<synchronous>, transform_indices = @transform_3, window_bounds = array<i64: 1, 128>}, {pipeline_mode = #tpu.pipeline_mode<synchronous>, transform_indices = @transform_4, window_bounds = array<i64: 128, 128>}, {pipeline_mode = #tpu.pipeline_mode<synchronous>, transform_indices = @transform_5, window_bounds = array<i64: 1, 128>}, {transform_indices = @transform_6, window_bounds = array<i64: 1, 256, 128>}]} {
    %c0 = arith.constant 0 : index
    %c0_0 = arith.constant 0 : index
    %c0_1 = arith.constant 0 : index
    %0 = vector.load %arg2[%c0, %c0_0, %c0_1] : memref<1x256x128xf32, #tpu.memory_space<vmem>>, vector<1x256x128xf32>
    %1 = vector.shape_cast %0 : vector<1x256x128xf32> to vector<256x128xf32>
    %c0_2 = arith.constant 0 : index
    %c0_3 = arith.constant 0 : index
    %2 = vector.load %arg4[%c0_2, %c0_3] : memref<128x128xf32, #tpu.memory_space<vmem>>, vector<128x128xf32>
    %cst = arith.constant dense<0.000000e+00> : vector<256x128xf32>
    %3 = tpu.matmul %1, %2, %cst {dimension_numbers = #tpu.dot_dimension_numbers<[1], [0], [0], [1], [0, 0, 1, 1], [], []>} : vector<256x128xf32>, vector<128x128xf32>, vector<256x128xf32> -> vector<256x128xf32>
    %c0_4 = arith.constant 0 : index
    %c0_5 = arith.constant 0 : index
    %4 = vector.load %arg5[%c0_4, %c0_5] : memref<1x128xf32, #tpu.memory_space<vmem>>, vector<1x128xf32>
    %5 = vector.broadcast %4 : vector<1x128xf32> to vector<256x128xf32>
    %6 = arith.addf %3, %5 : vector<256x128xf32>
    %cst_6 = arith.constant 0.000000e+00 : f32
    %7 = vector.broadcast %cst_6 : f32 to vector<256x128xf32>
    %8 = arith.maximumf %6, %7 : vector<256x128xf32>
    %c0_7 = arith.constant 0 : index
    %c0_8 = arith.constant 0 : index
    %9 = vector.load %arg6[%c0_7, %c0_8] : memref<128x128xf32, #tpu.memory_space<vmem>>, vector<128x128xf32>
    %cst_9 = arith.constant dense<0.000000e+00> : vector<256x128xf32>
    %10 = tpu.matmul %8, %9, %cst_9 {dimension_numbers = #tpu.dot_dimension_numbers<[1], [0], [0], [1], [0, 0, 1, 1], [], []>} : vector<256x128xf32>, vector<128x128xf32>, vector<256x128xf32> -> vector<256x128xf32>
    %c0_10 = arith.constant 0 : index
    %c0_11 = arith.constant 0 : index
    %11 = vector.load %arg7[%c0_10, %c0_11] : memref<1x128xf32, #tpu.memory_space<vmem>>, vector<1x128xf32>
    %12 = vector.broadcast %11 : vector<1x128xf32> to vector<256x128xf32>
    %13 = arith.addf %10, %12 : vector<256x128xf32>
    %c0_12 = arith.constant 0 : index
    %c0_13 = arith.constant 0 : index
    %c0_14 = arith.constant 0 : index
    %14 = vector.load %arg3[%c0_12, %c0_13, %c0_14] : memref<1x1x128xf32, #tpu.memory_space<vmem>>, vector<1x1x128xf32>
    %15 = vector.shape_cast %14 : vector<1x1x128xf32> to vector<1x128xf32>
    %16 = vector.broadcast %15 : vector<1x128xf32> to vector<256x128xf32>
    %17 = arith.addf %13, %16 : vector<256x128xf32>
    %18 = arith.negf %17 : vector<256x128xf32>
    %19 = math.exp %18 : vector<256x128xf32>
    %cst_15 = arith.constant 1.000000e+00 : f32
    %20 = vector.broadcast %cst_15 : f32 to vector<256x128xf32>
    %21 = arith.addf %20, %19 : vector<256x128xf32>
    %22 = arith.divf %20, %21 : vector<256x128xf32>
    %23 = arith.mulf %1, %22 : vector<256x128xf32>
    %c0_16 = arith.constant 0 : index
    %c0_17 = arith.constant 0 : index
    %c0_18 = arith.constant 0 : index
    %24 = vector.load %arg8[%c0_16, %c0_17, %c0_18] : memref<1x256x128xf32, #tpu.memory_space<vmem>>, vector<1x256x128xf32>
    %25 = vector.shape_cast %24 : vector<1x256x128xf32> to vector<256x128xf32>
    %26 = vector.shape_cast %23 : vector<256x128xf32> to vector<1x256x128xf32>
    tpu.vector_store %arg8[%c0_16, %c0_17, %c0_18], %26 {strides = array<i32>} : memref<1x256x128xf32, #tpu.memory_space<vmem>>, vector<1x256x128xf32>,
    return
  }
  func.func @transform_0(%arg0: i32, %arg1: i32) -> (i32, i32, i32) {
    %c0_i32 = arith.constant 0 : i32
    %c0_i32_0 = arith.constant 0 : i32
    return %arg0, %arg1, %c0_i32 : i32, i32, i32
  }
  func.func @transform_1(%arg0: i32, %arg1: i32) -> (i32, i32, i32) {
    %c0_i32 = arith.constant 0 : i32
    %c0_i32_0 = arith.constant 0 : i32
    %c0_i32_1 = arith.constant 0 : i32
    return %arg0, %c0_i32, %c0_i32_0 : i32, i32, i32
  }
  func.func @transform_2(%arg0: i32, %arg1: i32) -> (i32, i32) {
    %c0_i32 = arith.constant 0 : i32
    %c0_i32_0 = arith.constant 0 : i32
    %c0_i32_1 = arith.constant 0 : i32
    return %c0_i32, %c0_i32_0 : i32, i32
  }
  func.func @transform_3(%arg0: i32, %arg1: i32) -> (i32, i32) {
    %c0_i32 = arith.constant 0 : i32
    %c0_i32_0 = arith.constant 0 : i32
    %c0_i32_1 = arith.constant 0 : i32
    return %c0_i32, %c0_i32_0 : i32, i32
  }
  func.func @transform_4(%arg0: i32, %arg1: i32) -> (i32, i32) {
    %c0_i32 = arith.constant 0 : i32
    %c0_i32_0 = arith.constant 0 : i32
    %c0_i32_1 = arith.constant 0 : i32
    return %c0_i32, %c0_i32_0 : i32, i32
  }
  func.func @transform_5(%arg0: i32, %arg1: i32) -> (i32, i32) {
    %c0_i32 = arith.constant 0 : i32
    %c0_i32_0 = arith.constant 0 : i32
    %c0_i32_1 = arith.constant 0 : i32
    return %c0_i32, %c0_i32_0 : i32, i32
  }
  func.func @transform_6(%arg0: i32, %arg1: i32) -> (i32, i32, i32) {
    %c0_i32 = arith.constant 0 : i32
    %c0_i32_0 = arith.constant 0 : i32
    return %arg0, %arg1, %c0_i32 : i32, i32, i32
  }
}

</mosaic_0001>

<bundles_post_ra>
// kernel: tpu_custom_call.1
= control target key start
LH: loop header
LB: loop body
LE: loop exit
PB: predicated region body
PF: predicated region fallthrough
CT: control target
= control target key end

     0   :  { %s3059_s0 = inlined_call_operand.hbm [shape: f32[2,256,128], index: 0, kind: input, shape index: {}]   ;;  %s3060_s1 = inlined_call_operand.hbm [shape: f32[2,1,128], index: 1, kind: input, shape index: {}]   ;;  %s3061_s2 = inlined_call_operand.hbm [shape: f32[128,128], index: 2, kind: input, shape index: {}]   ;;  %s3062_s3 = inlined_call_operand.vmem [shape: f32[1,128], index: 3, kind: input, shape index: {}]   ;;  %s3063_s4 = inlined_call_operand.hbm [shape: f32[128,128], index: 4, kind: input, shape index: {}]   ;;  %s3064_s5 = inlined_call_operand.vmem [shape: f32[1,128], index: 5, kind: input, shape index: {}]   ;;  %s3065_s6 = inlined_call_operand.hbm [shape: f32[2,256,128], index: 6, kind: output, shape index: {}]  }
   0x1   :  { %3071 = sst [smem:[#allocation20_spill]] %s3061_s2 }
   0x2   :  { %3072 = sst [smem:[#allocation21_spill]] %s3063_s4 }
   0x3   :  { %11 = vsyncpa [#allocation3], 0 }
   0x4   :  { %13 = vsyncpa [#allocation3 + $0x1], 0 }
   0x5   :  { %14 = vsyncpa [#allocation6], 0 }
   0x6   :  { %16 = vsyncpa [#allocation6 + $0x1], 0 }
   0x7   :  { %17 = vsyncpa [#allocation9], 0 }
   0x8   :  { %18 = vsyncpa [#allocation4], 0 }
   0x9   :  { %20 = vsyncpa [#allocation4 + $0x1], 0  ;;  %s2131_s21 = smov 0   ;;  %s2133_s22 = smov 0  }
   0xa   :  { %s2135_s23 = smov 0   ;;  %s2137_s24 = smov 0  }
   0xb   :  { %s2139_s25 = smov 0   ;;  %s2141_s26 = smov 0  }
   0xc LB: > { %3073 = sst [smem:[#allocation16_spill]] %s2068_s21  ;;  %s2162_s27 = sadd.s32 4294967295, %s2088_s26   ;;  %s2088_s26 = sphi %s2141_s26, %s26_s26   ;;  %s2084_s25 = sphi %s2139_s25, %s3170_s25   ;;  %s2080_s24 = sphi %s2137_s24, %s3169_s24   ;;  %s2076_s23 = sphi %s2135_s23, %s3168_s23   ;;  %s2072_s22 = sphi %s2133_s22, %s3167_s22   ;;  %s2068_s21 = sphi %s2131_s21, %s3166_s21  }
   0xd   : > { %s1542_s28 = sadd.s32 4294967294, %s2088_s26   ;;  %p60_p0 = scmp.ne.s32.totalorder %s2072_s22, %s2068_s21 }
   0xe   : > { %p61_p1 = scmp.eq.s32.totalorder %s2162_s27, 0  ;;  %p196_p2 = scmp.eq.s32.totalorder %s2162_s27, 1 }
   0xf   : > { %p202_p3 = scmp.eq.s32.totalorder %s1542_s28, 1  ;;  %p1543_p5 = scmp.ge.s32.totalorder %s2088_s26, 1 }
  0x10   : > { %p2171_p4 = por %p61_p1, %p60_p0  ;;  %p209_p7 = scmp.lt.s32.totalorder %s2088_s26, 3 }
  0x11   : > { %p2176_p6 = por %p202_p3, %p60_p0  ;;  %s3077_s2 = sld [smem:[#allocation20_spill]] }
  0x12   : > { %p2184_p8 = pnand %p1543_p5, %p209_p7  ;;  %s2090_s11 = smov [#allocation7]  }
  0x13   : > { %s3075_s30 = scalar_select %p2176_p6, 1, 0 }
  0x14   : > { %p1640_p9 = pneg %p2184_p8  ;;  %s222_s12 = sshll.u32 %s2090_s11, 4  ;;  %s223_s12 = int_to_ptr.vmem [resolvable:$true] %s222_s12 }
  0x15   : > { %3076 = sst [smem:[#allocation17_spill]] %s3075_s30  ;;  %p1546_p11 = scmp.ge.s32.totalorder %s2088_s26, 2 }
  0x16   : > { %p1641_p10 = pnand %p1640_p9, %p61_p1  ;;  %s3079_s4 = sld [smem:[#allocation21_spill]] }
  0x17   : > { %s220_s9 = sshll.u32 %s3077_s2, 4  ;;  %s3066_s16 = smov 128   ;;  %s221_s9 = int_to_ptr.hbm [resolvable:$true] %s220_s9 }
  0x18   : > { %s3067_s17 = smov 8   ;;  %s2093_s18 = smov [#allocation8]  }
  0x19   : > { %1643 = dma.hbm_to_vmem [thread:$0]  (!%p1641_p10), %s221_s9, 2048, %s223_s12, [#allocation6], %s3066_s16, %s3066_s16, %s3067_s17  }
  0x1a   : > { %s239_s19 = sshll.u32 %s2093_s18, 4  ;;  %s38_s20 = sadd.s32 1, %s2084_s25  ;;  %s240_s19 = int_to_ptr.vmem [resolvable:$true] %s239_s19 }
  0x1b   : > { %s47_s28 = sadd.s32 1, %s2076_s23  ;;  %p40_p12 = scmp.ge.s32.totalorder %s38_s20, 2 }
  0x1c   : > { %s237_s15 = sshll.u32 %s3079_s4, 4  ;;  %p54_p13 = scmp.ne.s32.totalorder %s2076_s23, %s2072_s22  ;;  %s238_s15 = int_to_ptr.hbm [resolvable:$true] %s237_s15 }
  0x1d   : > { %1646 = dma.hbm_to_vmem [thread:$0]  (!%p1641_p10), %s238_s15, 2048, %s240_s19, [#allocation9], %s3066_s16, %s3066_s16, %s3067_s17  }
  0x1e   : > { %p55_p0 = scmp.eq.s32.totalorder %s2088_s26, 0  ;;  %p1660_p3 = scmp.lt.s32.totalorder %s2088_s26, 2 }
  0x1f   : > { %s3172_s20 = smov (%p40_p12, %s38_s20), 0  ;;  %p2216_p7 = por %p196_p2, %p54_p13 }
  0x20   : > { %3080 = sst [smem:[#allocation18_spill]] %s3172_s20  ;;  %p2210_p5 = por %p55_p0, %p54_p13 }
  0x21   : > { %s42_s9 = ssub.s32 %s2084_s25, %s3172_s20  ;;  %s256_s11 = sand.u32 1, %s2076_s23  }
  0x22   : > { %p45_p9 = scmp.eq.s32.totalorder %s42_s9, 0  ;;  %s1547_s12 = sshll.u32 %s256_s11, 8 }
  0x23   : > { %s1592_s13 = sshll.u32 %s2084_s25, 8  ;;  %s260_s17 = scalar_lea.vmem [#allocation2], %s1547_s12 }
  0x24   : > { %s2225_s14 = scalar_select %p45_p9, %s2076_s23, %s47_s28  }
  0x25   : > { %s267_s19 = scalar_lea.hbm %s3059_s0, %s1592_s13  ;;  %s270_s2 = sshll.u32 %s260_s17, 4  ;;  %s271_s2 = int_to_ptr.vmem [resolvable:$true] %s270_s2 }
  0x26   : > { %3083 = sst [smem:[#allocation19_spill]] %s2225_s14  ;;  %s268_s16 = sshll.u32 %s267_s19, 4  ;;  %s269_s16 = int_to_ptr.hbm [resolvable:$true] %s268_s16 }
  0x27   : > { %p1648_p2 = pnand %p1660_p3, %p2210_p5  ;;  %s280_s4 = sand.u32 1, %s2088_s26  }
  0x28   : > { %s286_s9 = scalar_lea.hbm %s3060_s1, %s2084_s25  ;;  %s257_s21 = scalar_lea.sflag [#allocation3], %s256_s11 }
  0x29   : > { %s3084_s28 = smov 8   ;;  %s3085_s14 = smov 128  }
  0x2a   : > { %1650 = dma.hbm_to_vmem [thread:$0]  (!%p1648_p2), %s269_s16, 4096, %s271_s2, %s257_s21, %s3085_s14, %s3085_s14, %s3084_s28  }
  0x2b   : > { %s288_s15 = sshll.u32 %s286_s9, 4  ;;  %s283_s13 = scalar_lea.vmem [#allocation5], %s256_s11  ;;  %s289_s15 = int_to_ptr.hbm [resolvable:$true] %s288_s15 }
  0x2c   : > { %s290_s18 = sshll.u32 %s283_s13, 4  ;;  %s281_s17 = scalar_lea.sflag [#allocation6], %s280_s4  ;;  %s291_s18 = int_to_ptr.vmem [resolvable:$true] %s290_s18 }
  0x2d   : > { %1653 = dma.hbm_to_vmem [thread:$0]  (!%p1648_p2), %s289_s15, 16, %s291_s18, %s281_s17  }
  0x2e   : > { %299 = sbr.rel (%p2184_p8) target bundleno = 527 (0x20f), region = 44  ;;  %s2245_s7 = sand.u32 (!%p2184_p8), 1, %s2072_s22  }
  0x2f   : > { %s1551_s30 = sshll.u32 (!%p2184_p8), %s2245_s7, 8  ;;  %s302_s20 = scalar_lea.sflag (!%p2184_p8), [#allocation3], %s2245_s7 }
  0x30   : > { %s2251_s2 = scalar_lea.vmem (!%p2184_p8), [#allocation2], %s1551_s30 }
  0x33   : > { %2047 = dma.done.wait (%p2171_p4), %s302_s20, 4096  }
  0x34   : > { %2049 = vsyncadd (%p2171_p4), %s302_s20, 4294963200  ;;  %s311_s4 = sand.u32 1, %s2162_s27   ;;  %s314_s10 = scalar_lea.vmem [#allocation5], %s2245_s7 }
  0x35   : > { %s312_s21 = scalar_lea.sflag [#allocation6], %s311_s4 }
  0x36   : > { %2051 = dma.done.wait (%p2171_p4), %s312_s21, 16  }
  0x37   : > { %2053 = vsyncadd (%p2171_p4), %s312_s21, 4294967280 }
  0x38   : > { %2055 = dma.done.wait (%p61_p1), [#allocation6], 2048  }
  0x39   : > { %2057 = vsyncadd (%p61_p1), [#allocation6], 4294965248 }
  0x3a   : > { %2059 = dma.done.wait (%p61_p1), [#allocation9], 2048  }
  0x3b   : > { %2061 = vsyncadd (%p61_p1), [#allocation9], 4294965248  ;;  %v407_v0 = vld [vmem:[#allocation7 + $0x78] sm:$0xff]  ;;  %v406_v1 = vld [vmem:[#allocation7 + $0x70] sm:$0xff]  ;;  %s2414_s12 = scalar_lea.vmem [#allocation10], %s1551_s30  ;;  %s1593_s9 = sshll.u32 %s2080_s24, 8 }
  0x3c   : > { %412 = vmatpush.msra.mxu0 %v407_v0  ;;  %1594 = vmatpush.msra.mxu2 %v407_v0  ;;  %v405_v2 = vld [vmem:[#allocation7 + $0x68] sm:$0xff]  ;;  %v404_v3 = vld [vmem:[#allocation7 + $0x60] sm:$0xff]  ;;  %v403_v4 = vld [vmem:[#allocation7 + $0x58] sm:$0xff]  ;;  %s1412_s15 = scalar_lea.hbm %s3065_s6, %s1593_s9  ;;  %s1413_s13 = sshll.u32 %s2414_s12, 4  ;;  %s1414_s13 = int_to_ptr.vmem [resolvable:$true] %s1413_s13 }
  0x3d   : > { %v402_v5 = vld [vmem:[#allocation7 + $0x50] sm:$0xff]  ;;  %v401_v6 = vld [vmem:[#allocation7 + $0x48] sm:$0xff]  ;;  %v400_v7 = vld [vmem:[#allocation7 + $0x40] sm:$0xff]  ;;  %s1415_s18 = sshll.u32 %s1412_s15, 4  ;;  %s1399_s17 = scalar_lea.sflag [#allocation4], %s2245_s7  ;;  %s1416_s18 = int_to_ptr.hbm [resolvable:$true] %s1415_s18 }
  0x3e   : > { %413 = vmatpush.msra.mxu0 %v406_v1  ;;  %1595 = vmatpush.msra.mxu2 %v406_v1  ;;  %v399_v8 = vld [vmem:[#allocation7 + $0x38] sm:$0xff]  ;;  %v398_v9 = vld [vmem:[#allocation7 + $0x30] sm:$0xff]  ;;  %v397_v10 = vld [vmem:[#allocation7 + $0x28] sm:$0xff]  ;;  %s2008_s30 = sshra.s32 %s1416_s18, 4  ;;  %s2009_s30 = int_to_ptr.hbm [resolvable:$true] %s2008_s30 }
  0x3f   : > { %v396_v11 = vld [vmem:[#allocation7 + $0x20] sm:$0xff]  ;;  %v395_v12 = vld [vmem:[#allocation7 + $0x18] sm:$0xff]  ;;  %v394_v13 = vld [vmem:[#allocation7 + $0x10] sm:$0xff]  ;;  %s2010_s20 = scalar_lea.hbm %s2009_s30, 256  ;;  %p2015_p10 = scmp.lt.s32.totalorder %s2009_s30, %s3065_s6 }
  0x40   : > { %414 = vmatpush.msra.mxu0 %v405_v2  ;;  %1596 = vmatpush.msra.mxu2 %v405_v2  ;;  %v393_v14 = vld [vmem:[#allocation7 + $0x8] sm:$0xff]  ;;  %v392_v15 = vld [vmem:[#allocation7] sm:$0xff]  ;;  %v2296_v22 = vld [vmem:[%s2251_s2 + $0x18] sm:$0xff]  ;;  %p2011_p1 = scmp.ne.s32.totalorder %s2009_s30, %s2010_s20 }
  0x41   : > { %v2272_v16 = vld [vmem:[%s2251_s2] sm:$0xff]  ;;  %v2280_v18 = vld [vmem:[%s2251_s2 + $0x8] sm:$0xff]  ;;  %v2288_v20 = vld [vmem:[%s2251_s2 + $0x10] sm:$0xff] }
  0x42   : > { %415 = vmatpush.msra.mxu0 %v404_v3  ;;  %1597 = vmatpush.msra.mxu2 %v404_v3  ;;  %v2275_v17 = vld [vmem:[%s2251_s2 + $0x80] sm:$0xff]  ;;  %v2283_v19 = vld [vmem:[%s2251_s2 + $0x88] sm:$0xff]  ;;  %v2291_v21 = vld [vmem:[%s2251_s2 + $0x90] sm:$0xff]  ;;  %p2012_p4 = pnand %p2011_p1, %p2216_p7 }
  0x43   : > { %v2299_v23 = vld [vmem:[%s2251_s2 + $0x98] sm:$0xff]  ;;  %v2304_v24 = vld [vmem:[%s2251_s2 + $0x20] sm:$0xff]  ;;  %v365_v26 = vld [vmem:[%s2251_s2 + $0x28] sm:$0xff] }
  0x44   : > { %416 = vmatpush.msra.mxu0 %v403_v4  ;;  %1598 = vmatpush.msra.mxu2 %v403_v4  ;;  %v380_v25 = vld [vmem:[%s2251_s2 + $0xa0] sm:$0xff]  ;;  %v381_v27 = vld [vmem:[%s2251_s2 + $0xa8] sm:$0xff]  ;;  %v366_v28 = vld [vmem:[%s2251_s2 + $0x30] sm:$0xff]  ;;  %p2013_p8 = pneg %p2012_p4 }
  0x45   : > { %v382_v29 = vld [vmem:[%s2251_s2 + $0xb0] sm:$0xff]  ;;  %v367_v30 = vld [vmem:[%s2251_s2 + $0x38] sm:$0xff]  ;;  %v368_v32 = vld [vmem:[%s2251_s2 + $0x40] sm:$0xff] }
  0x46   : > { %417 = vmatpush.msra.mxu0 %v402_v5  ;;  %1599 = vmatpush.msra.mxu2 %v402_v5  ;;  %v383_v31 = vld [vmem:[%s2251_s2 + $0xb8] sm:$0xff]  ;;  %v384_v33 = vld [vmem:[%s2251_s2 + $0xc0] sm:$0xff]  ;;  %v570_v36 = vld [vmem:[#allocation8 + $0x68] sm:$0xff] }
  0x47   : > { %v572_v34 = vld [vmem:[#allocation8 + $0x78] sm:$0xff]  ;;  %v571_v35 = vld [vmem:[#allocation8 + $0x70] sm:$0xff]  ;;  %v369_v37 = vld [vmem:[%s2251_s2 + $0x48] sm:$0xff] }
  0x48   : > { %418 = vmatpush.msra.mxu0 %v401_v6  ;;  %1600 = vmatpush.msra.mxu2 %v401_v6  ;;  %v385_v38 = vld [vmem:[%s2251_s2 + $0xc8] sm:$0xff]  ;;  %v568_v40 = vld [vmem:[#allocation8 + $0x58] sm:$0xff]  ;;  %v567_v41 = vld [vmem:[#allocation8 + $0x50] sm:$0xff] }
  0x49   : > { %577 = vmatpush.msra.mxu1 %v572_v34  ;;  %1610 = vmatpush.msra.mxu3 %v572_v34  ;;  %v569_v39 = vld [vmem:[#allocation8 + $0x60] sm:$0xff]  ;;  %v566_v42 = vld [vmem:[#allocation8 + $0x48] sm:$0xff]  ;;  %v564_v46 = vld [vmem:[#allocation8 + $0x38] sm:$0xff] }
  0x4a   : > { %419 = vmatpush.msra.mxu0 %v400_v7  ;;  %1601 = vmatpush.msra.mxu2 %v400_v7  ;;  %v370_v43 = vld [vmem:[%s2251_s2 + $0x50] sm:$0xff]  ;;  %v565_v45 = vld [vmem:[#allocation8 + $0x40] sm:$0xff]  ;;  %v371_v49 = vld [vmem:[%s2251_s2 + $0x58] sm:$0xff] }
  0x4b   : > { %578 = vmatpush.msra.mxu1 %v571_v35  ;;  %1611 = vmatpush.msra.mxu3 %v571_v35  ;;  %v386_v44 = vld [vmem:[%s2251_s2 + $0xd0] sm:$0xff]  ;;  %v387_v50 = vld [vmem:[%s2251_s2 + $0xd8] sm:$0xff]  ;;  %v561_v51 = vld [vmem:[#allocation8 + $0x20] sm:$0xff] }
  0x4c   : > { %420 = vmatpush.msra.mxu0 %v399_v8  ;;  %1602 = vmatpush.msra.mxu2 %v399_v8  ;;  %v563_v47 = vld [vmem:[#allocation8 + $0x30] sm:$0xff]  ;;  %v562_v48 = vld [vmem:[#allocation8 + $0x28] sm:$0xff]  ;;  %v560_v52 = vld [vmem:[#allocation8 + $0x18] sm:$0xff] }
  0x4d   : > { %579 = vmatpush.msra.mxu1 %v570_v36  ;;  %1612 = vmatpush.msra.mxu3 %v570_v36  ;;  %v559_v53 = vld [vmem:[#allocation8 + $0x10] sm:$0xff]  ;;  %v372_v54 = vld [vmem:[%s2251_s2 + $0x60] sm:$0xff]  ;;  %v558_v56 = vld [vmem:[#allocation8 + $0x8] sm:$0xff] }
  0x4e   : > { %421 = vmatpush.msra.mxu0 %v398_v9  ;;  %1603 = vmatpush.msra.mxu2 %v398_v9  ;;  %v388_v55 = vld [vmem:[%s2251_s2 + $0xe0] sm:$0xff]  ;;  %v373_v58 = vld [vmem:[%s2251_s2 + $0x68] sm:$0xff]  ;;  %v374_v60 = vld [vmem:[%s2251_s2 + $0x70] sm:$0xff] }
  0x4f   : > { %580 = vmatpush.msra.mxu1 %v569_v39  ;;  %1613 = vmatpush.msra.mxu3 %v569_v39  ;;  %v557_v57 = vld [vmem:[#allocation8] sm:$0xff]  ;;  %v390_v61 = vld [vmem:[%s2251_s2 + $0xf0] sm:$0xff]  ;;  %v375_v62 = vld [vmem:[%s2251_s2 + $0x78] sm:$0xff] }
  0x50   : > { %422 = vmatpush.msra.mxu0 %v397_v10  ;;  %1604 = vmatpush.msra.mxu2 %v397_v10  ;;  %v389_v59 = vld [vmem:[%s2251_s2 + $0xe8] sm:$0xff]  ;;  %v391_v63 = vld [vmem:[%s2251_s2 + $0xf8] sm:$0xff]  ;;  %v2333_v0 = vld [vmem:[%s3062_s3] ss:$0 sm:$0xff] }
  0x51   : > { %581 = vmatpush.msra.mxu1 %v568_v40  ;;  %1614 = vmatpush.msra.mxu3 %v568_v40 }
  0x52   : > { %423 = vmatpush.msra.mxu0 %v396_v11  ;;  %1605 = vmatpush.msra.mxu2 %v396_v11 }
  0x53   : > { %582 = vmatpush.msra.mxu1 %v567_v41  ;;  %1615 = vmatpush.msra.mxu3 %v567_v41 }
  0x54   : > { %424 = vmatpush.msra.mxu0 %v395_v12  ;;  %1606 = vmatpush.msra.mxu2 %v395_v12 }
  0x55   : > { %583 = vmatpush.msra.mxu1 %v566_v42  ;;  %1616 = vmatpush.msra.mxu3 %v566_v42 }
  0x56   : > { %425 = vmatpush.msra.mxu0 %v394_v13  ;;  %1607 = vmatpush.msra.mxu2 %v394_v13 }
  0x57   : > { %584 = vmatpush.msra.mxu1 %v565_v45  ;;  %1617 = vmatpush.msra.mxu3 %v565_v45 }
  0x58   : > { %426 = vmatpush.msra.mxu0 %v393_v14  ;;  %1608 = vmatpush.msra.mxu2 %v393_v14 }
  0x59   : > { %585 = vmatpush.msra.mxu1 %v564_v46  ;;  %1618 = vmatpush.msra.mxu3 %v564_v46 }
  0x5a   : > { %427 = vmatpush.msra.mxu0 %v392_v15  ;;  %1609 = vmatpush.msra.mxu2 %v392_v15 }
  0x5b   : > { %428 = vmatmul.f32.vlgmr.msra.gmra.mxu0 %v2272_v16  ;;  %476 = vmatmul.f32.vlgmr.msra.gmra.mxu2 %v2275_v17 }
  0x5c   : > { %586 = vmatpush.msra.mxu1 %v563_v47  ;;  %1619 = vmatpush.msra.mxu3 %v563_v47 }
  0x5e   : > { %587 = vmatpush.msra.mxu1 %v562_v48  ;;  %1620 = vmatpush.msra.mxu3 %v562_v48 }
  0x60   : > { %588 = vmatpush.msra.mxu1 %v561_v51  ;;  %1621 = vmatpush.msra.mxu3 %v561_v51 }
  0x62   : > { %589 = vmatpush.msra.mxu1 %v560_v52  ;;  %1622 = vmatpush.msra.mxu3 %v560_v52 }
  0x63   : > { %431 = vmatmul.f32.gmra.mxu0 %v2280_v18  ;;  %479 = vmatmul.f32.gmra.mxu2 %v2283_v19 }
  0x64   : > { %590 = vmatpush.msra.mxu1 %v559_v53  ;;  %1623 = vmatpush.msra.mxu3 %v559_v53 }
  0x66   : > { %591 = vmatpush.msra.mxu1 %v558_v56  ;;  %1624 = vmatpush.msra.mxu3 %v558_v56 }
  0x68   : > { %592 = vmatpush.msra.mxu1 %v557_v57  ;;  %1625 = vmatpush.msra.mxu3 %v557_v57 }
  0x6b   : > { %434 = vmatmul.f32.gmra.mxu0 %v2288_v20  ;;  %482 = vmatmul.f32.gmra.mxu2 %v2291_v21 }
  0x73   : > { %437 = vmatmul.f32.gmra.mxu0 %v2296_v22  ;;  %485 = vmatmul.f32.gmra.mxu2 %v2299_v23 }
  0x7b   : > { %440 = vmatmul.f32.gmra.mxu0 %v2304_v24  ;;  %488 = vmatmul.f32.gmra.mxu2 %v380_v25 }
  0x83   : > { %443 = vmatmul.f32.gmra.mxu0 %v365_v26  ;;  %491 = vmatmul.f32.gmra.mxu2 %v381_v27 }
  0x8b   : > { %446 = vmatmul.f32.gmra.mxu0 %v366_v28  ;;  %494 = vmatmul.f32.gmra.mxu2 %v382_v29 }
  0x93   : > { %449 = vmatmul.f32.gmra.mxu0 %v367_v30  ;;  %497 = vmatmul.f32.gmra.mxu2 %v383_v31 }
  0x9b   : > { %452 = vmatmul.f32.gmra.mxu0 %v368_v32  ;;  %500 = vmatmul.f32.gmra.mxu2 %v384_v33 }
  0xa3   : > { %455 = vmatmul.f32.gmra.mxu0 %v369_v37  ;;  %503 = vmatmul.f32.gmra.mxu2 %v385_v38 }
  0xab   : > { %458 = vmatmul.f32.gmra.mxu0 %v370_v43  ;;  %506 = vmatmul.f32.gmra.mxu2 %v386_v44 }
  0xb3   : > { %461 = vmatmul.f32.gmra.mxu0 %v371_v49  ;;  %509 = vmatmul.f32.gmra.mxu2 %v387_v50 }
  0xbb   : > { %464 = vmatmul.f32.gmra.mxu0 %v372_v54  ;;  %512 = vmatmul.f32.gmra.mxu2 %v388_v55 }
  0xc3   : > { %467 = vmatmul.f32.gmra.mxu0 %v373_v58  ;;  %515 = vmatmul.f32.gmra.mxu2 %v389_v59 }
  0xcb   : > { %470 = vmatmul.f32.gmra.mxu0 %v374_v60  ;;  %518 = vmatmul.f32.gmra.mxu2 %v390_v61 }
  0xd3   : > { %473 = vmatmul.f32.gmra.mxu0 %v375_v62  ;;  %521 = vmatmul.f32.gmra.mxu2 %v391_v63 }
  0xd8   : > { %v429_v1 = vpop.f32.mrf.mxu0 }
  0xd9   : > { %v430_v2 = vadd.f32 %v2333_v0, %v429_v1 }
  0xdb   : > { %v525_v3 = vmax.f32 %v430_v2, 0.0 }
  0xdd   : > { %593 = vmatmul.f32.vlgmr.msra.gmra.mxu1 %v525_v3 }
  0xde   : > { %v477_v4 = vpop.f32.mrf.mxu2 }
  0xdf   : > { %v478_v5 = vadd.f32 %v2333_v0, %v477_v4 }
  0xe0   : > { %v432_v6 = vpop.f32.mrf.mxu0 }
  0xe1   : > { %v541_v7 = vmax.f32 %v478_v5, 0.0  ;;  %v433_v8 = vadd.f32 %v2333_v0, %v432_v6 }
  0xe3   : > { %v526_v9 = vmax.f32 %v433_v8, 0.0  ;;  %641 = vmatmul.f32.vlgmr.msra.gmra.mxu3 %v541_v7 }
  0xe5   : > { %596 = vmatmul.f32.gmra.mxu1 %v526_v9 }
  0xe6   : > { %v480_v10 = vpop.f32.mrf.mxu2 }
  0xe7   : > { %v481_v11 = vadd.f32 %v2333_v0, %v480_v10 }
  0xe8   : > { %v435_v12 = vpop.f32.mrf.mxu0 }
  0xe9   : > { %v542_v13 = vmax.f32 %v481_v11, 0.0  ;;  %v436_v14 = vadd.f32 %v2333_v0, %v435_v12 }
  0xeb   : > { %v527_v15 = vmax.f32 %v436_v14, 0.0  ;;  %644 = vmatmul.f32.gmra.mxu3 %v542_v13 }
  0xed   : > { %599 = vmatmul.f32.gmra.mxu1 %v527_v15 }
  0xee   : > { %v483_v25 = vpop.f32.mrf.mxu2 }
  0xef   : > { %v484_v26 = vadd.f32 %v2333_v0, %v483_v25 }
  0xf0   : > { %v438_v27 = vpop.f32.mrf.mxu0 }
  0xf1   : > { %v543_v28 = vmax.f32 %v484_v26, 0.0  ;;  %v439_v29 = vadd.f32 %v2333_v0, %v438_v27 }
  0xf3   : > { %v528_v30 = vmax.f32 %v439_v29, 0.0  ;;  %647 = vmatmul.f32.gmra.mxu3 %v543_v28 }
  0xf5   : > { %602 = vmatmul.f32.gmra.mxu1 %v528_v30 }
  0xf6   : > { %v486_v31 = vpop.f32.mrf.mxu2 }
  0xf7   : > { %v487_v32 = vadd.f32 %v2333_v0, %v486_v31 }
  0xf8   : > { %v441_v33 = vpop.f32.mrf.mxu0 }
  0xf9   : > { %v544_v34 = vmax.f32 %v487_v32, 0.0  ;;  %v442_v35 = vadd.f32 %v2333_v0, %v441_v33 }
  0xfb   : > { %v529_v36 = vmax.f32 %v442_v35, 0.0  ;;  %650 = vmatmul.f32.gmra.mxu3 %v544_v34 }
  0xfd   : > { %605 = vmatmul.f32.gmra.mxu1 %v529_v36 }
  0xfe   : > { %v489_v37 = vpop.f32.mrf.mxu2 }
  0xff   : > { %v490_v38 = vadd.f32 %v2333_v0, %v489_v37 }
 0x100   : > { %v444_v39 = vpop.f32.mrf.mxu0 }
 0x101   : > { %v545_v40 = vmax.f32 %v490_v38, 0.0  ;;  %v445_v41 = vadd.f32 %v2333_v0, %v444_v39 }
 0x103   : > { %v530_v42 = vmax.f32 %v445_v41, 0.0  ;;  %653 = vmatmul.f32.gmra.mxu3 %v545_v40 }
 0x105   : > { %608 = vmatmul.f32.gmra.mxu1 %v530_v42 }
 0x106   : > { %v492_v43 = vpop.f32.mrf.mxu2 }
 0x107   : > { %v493_v44 = vadd.f32 %v2333_v0, %v492_v43 }
 0x108   : > { %v447_v45 = vpop.f32.mrf.mxu0 }
 0x109   : > { %v546_v46 = vmax.f32 %v493_v44, 0.0  ;;  %v448_v47 = vadd.f32 %v2333_v0, %v447_v45 }
 0x10b   : > { %v531_v48 = vmax.f32 %v448_v47, 0.0  ;;  %656 = vmatmul.f32.gmra.mxu3 %v546_v46 }
 0x10d   : > { %611 = vmatmul.f32.gmra.mxu1 %v531_v48 }
 0x10e   : > { %v495_v49 = vpop.f32.mrf.mxu2 }
 0x10f   : > { %v496_v50 = vadd.f32 %v2333_v0, %v495_v49 }
 0x110   : > { %v450_v51 = vpop.f32.mrf.mxu0 }
 0x111   : > { %v547_v52 = vmax.f32 %v496_v50, 0.0  ;;  %v451_v53 = vadd.f32 %v2333_v0, %v450_v51  ;;  %v2370_v51 = vld [vmem:[%s3064_s5] ss:$0 sm:$0xff] }
 0x113   : > { %v532_v54 = vmax.f32 %v451_v53, 0.0  ;;  %659 = vmatmul.f32.gmra.mxu3 %v547_v52  ;;  %v2374_v53 = vld [vmem:[%s314_s10] ss:$0 sm:$0xff] }
 0x115   : > { %614 = vmatmul.f32.gmra.mxu1 %v532_v54 }
 0x116   : > { %v498_v55 = vpop.f32.mrf.mxu2 }
 0x117   : > { %v499_v56 = vadd.f32 %v2333_v0, %v498_v55 }
 0x118   : > { %v453_v57 = vpop.f32.mrf.mxu0 }
 0x119   : > { %v548_v58 = vmax.f32 %v499_v56, 0.0  ;;  %v454_v59 = vadd.f32 %v2333_v0, %v453_v57 }
 0x11b   : > { %v533_v60 = vmax.f32 %v454_v59, 0.0  ;;  %662 = vmatmul.f32.gmra.mxu3 %v548_v58 }
 0x11d   : > { %617 = vmatmul.f32.gmra.mxu1 %v533_v60 }
 0x11e   : > { %v501_v61 = vpop.f32.mrf.mxu2 }
 0x11f   : > { %v502_v62 = vadd.f32 %v2333_v0, %v501_v61 }
 0x120   : > { %v456_v63 = vpop.f32.mrf.mxu0 }
 0x121   : > { %v549_v1 = vmax.f32 %v502_v62, 0.0  ;;  %v457_v2 = vadd.f32 %v2333_v0, %v456_v63 }
 0x123   : > { %v534_v3 = vmax.f32 %v457_v2, 0.0  ;;  %665 = vmatmul.f32.gmra.mxu3 %v549_v1 }
 0x125   : > { %620 = vmatmul.f32.gmra.mxu1 %v534_v3 }
 0x126   : > { %v504_v4 = vpop.f32.mrf.mxu2 }
 0x127   : > { %v505_v5 = vadd.f32 %v2333_v0, %v504_v4 }
 0x128   : > { %v459_v6 = vpop.f32.mrf.mxu0 }
 0x129   : > { %v550_v7 = vmax.f32 %v505_v5, 0.0  ;;  %v460_v8 = vadd.f32 %v2333_v0, %v459_v6 }
 0x12b   : > { %v535_v9 = vmax.f32 %v460_v8, 0.0  ;;  %668 = vmatmul.f32.gmra.mxu3 %v550_v7 }
 0x12d   : > { %623 = vmatmul.f32.gmra.mxu1 %v535_v9 }
 0x12e   : > { %v507_v10 = vpop.f32.mrf.mxu2 }
 0x12f   : > { %v508_v11 = vadd.f32 %v2333_v0, %v507_v10 }
 0x130   : > { %v462_v12 = vpop.f32.mrf.mxu0 }
 0x131   : > { %v551_v13 = vmax.f32 %v508_v11, 0.0  ;;  %v463_v14 = vadd.f32 %v2333_v0, %v462_v12 }
 0x133   : > { %v536_v15 = vmax.f32 %v463_v14, 0.0  ;;  %671 = vmatmul.f32.gmra.mxu3 %v551_v13 }
 0x135   : > { %626 = vmatmul.f32.gmra.mxu1 %v536_v15 }
 0x136   : > { %v510_v25 = vpop.f32.mrf.mxu2 }
 0x137   : > { %v511_v26 = vadd.f32 %v2333_v0, %v510_v25 }
 0x138   : > { %v465_v27 = vpop.f32.mrf.mxu0 }
 0x139   : > { %v552_v28 = vmax.f32 %v511_v26, 0.0  ;;  %v466_v29 = vadd.f32 %v2333_v0, %v465_v27 }
 0x13b   : > { %v537_v30 = vmax.f32 %v466_v29, 0.0  ;;  %674 = vmatmul.f32.gmra.mxu3 %v552_v28 }
 0x13d   : > { %629 = vmatmul.f32.gmra.mxu1 %v537_v30 }
 0x13e   : > { %v513_v31 = vpop.f32.mrf.mxu2 }
 0x13f   : > { %v514_v32 = vadd.f32 %v2333_v0, %v513_v31 }
 0x140   : > { %v468_v33 = vpop.f32.mrf.mxu0 }
 0x141   : > { %v553_v34 = vmax.f32 %v514_v32, 0.0  ;;  %v469_v35 = vadd.f32 %v2333_v0, %v468_v33 }
 0x143   : > { %v538_v36 = vmax.f32 %v469_v35, 0.0  ;;  %677 = vmatmul.f32.gmra.mxu3 %v553_v34 }
 0x145   : > { %632 = vmatmul.f32.gmra.mxu1 %v538_v36 }
 0x146   : > { %v516_v37 = vpop.f32.mrf.mxu2 }
 0x147   : > { %v517_v38 = vadd.f32 %v2333_v0, %v516_v37 }
 0x148   : > { %v471_v39 = vpop.f32.mrf.mxu0 }
 0x149   : > { %v554_v40 = vmax.f32 %v517_v38, 0.0  ;;  %v472_v41 = vadd.f32 %v2333_v0, %v471_v39 }
 0x14b   : > { %v539_v42 = vmax.f32 %v472_v41, 0.0  ;;  %680 = vmatmul.f32.gmra.mxu3 %v554_v40 }
 0x14d   : > { %635 = vmatmul.f32.gmra.mxu1 %v539_v42 }
 0x14e   : > { %v519_v43 = vpop.f32.mrf.mxu2 }
 0x14f   : > { %v520_v44 = vadd.f32 %v2333_v0, %v519_v43 }
 0x150   : > { %v474_v45 = vpop.f32.mrf.mxu0 }
 0x151   : > { %v555_v46 = vmax.f32 %v520_v44, 0.0  ;;  %v475_v47 = vadd.f32 %v2333_v0, %v474_v45 }
 0x153   : > { %v540_v48 = vmax.f32 %v475_v47, 0.0  ;;  %683 = vmatmul.f32.gmra.mxu3 %v555_v46 }
 0x155   : > { %638 = vmatmul.f32.gmra.mxu1 %v540_v48 }
 0x156   : > { %v522_v49 = vpop.f32.mrf.mxu2 }
 0x157   : > { %v523_v50 = vadd.f32 %v2333_v0, %v522_v49 }
 0x159   : > { %v556_v52 = vmax.f32 %v523_v50, 0.0 }
 0x15a   : > { %v594_v54 = vpop.f32.mrf.mxu1 }
 0x15b   : > { %v595_v55 = vadd.f32 %v2370_v51, %v594_v54  ;;  %686 = vmatmul.f32.gmra.mxu3 %v556_v52 }
 0x15d   : > { %v694_v56 = vadd.f32 %v2374_v53, %v595_v55 }
 0x15f   : > { %v1555_v57 = vmul.f32 -1.442695, %v694_v56 }
 0x161   : > { %1721 = vpow2.f32 %v1555_v57 }
 0x162   : > { %v597_v58 = vpop.f32.mrf.mxu1 }
 0x163   : > { %v598_v0 = vadd.f32 %v2370_v51, %v597_v58 }
 0x165   : > { %v695_v59 = vadd.f32 %v2374_v53, %v598_v0 }
 0x166   : > { %v642_v60 = vpop.f32.mrf.mxu3 }
 0x167   : > { %v1722_v61 = vpop.eup %1721  ;;  %v1556_v62 = vmul.f32 -1.442695, %v695_v59  ;;  %v643_v63 = vadd.f32 %v2370_v51, %v642_v60 }
 0x168   : > { %v822_v1 = vadd.f32 1.0, %v1722_v61 }
 0x169   : > { %1723 = vpow2.f32 %v1556_v62  ;;  %v710_v2 = vadd.f32 %v2374_v53, %v643_v63 }
 0x16a   : > { %1725 = vrcp.f32 %v822_v1  ;;  %v600_v3 = vpop.f32.mrf.mxu1  ;;  %vm859_vm0 = vweird.f32 %v822_v1  ;;  %v863_v15 = vand.u32 2147483647, %v822_v1  ;;  %v865_v25 = vand.u32 2147483648, %v822_v1 }
 0x16b   : > { %v1571_v4 = vmul.f32 -1.442695, %v710_v2  ;;  %v601_v5 = vadd.f32 %v2370_v51, %v600_v3 }
 0x16c   : > { %v866_v35 = vor.u32 1.1754944e-38, %v865_v25  ;;  %vm864_vm3 = vcmp.eq.f32.partialorder %v863_v15, 8.507059e+37 }
 0x16d   : > { %1727 = vpow2.f32 %v1571_v4  ;;  %v696_v6 = vadd.f32 %v2374_v53, %v601_v5 }
 0x16e   : > { %v645_v7 = vpop.f32.mrf.mxu3 }
 0x16f   : > { %v1724_v8 = vpop.eup %1723  ;;  %v1557_v9 = vmul.f32 -1.442695, %v696_v6  ;;  %v646_v10 = vadd.f32 %v2370_v51, %v645_v7 }
 0x170   : > { %v1726_v11 = vpop.eup %1725  ;;  %v823_v12 = vadd.f32 1.0, %v1724_v8 }
 0x171   : > { %v855_v13 = vmul.f32 %v1726_v11, %v822_v1  ;;  %1729 = vpow2.f32 %v1557_v9  ;;  %v711_v14 = vadd.f32 %v2374_v53, %v646_v10  ;;  %vm860_vm1 = vweird.f32 %v1726_v11 }
 0x172   : > { %1731 = vrcp.f32 %v823_v12  ;;  %v603_v26 = vpop.f32.mrf.mxu1  ;;  %vm2390_vm2 = vmor %vm859_vm0, %vm860_vm1  ;;  %v878_v41 = vand.u32 2147483647, %v823_v12  ;;  %v880_v46 = vand.u32 2147483648, %v823_v12  ;;  %vm874_vm4 = vweird.f32 %v823_v12 }
 0x173   : > { %v1728_v27 = vpop.eup %1727  ;;  %v856_v28 = vsub.f32 1.0, %v855_v13  ;;  %v1572_v29 = vmul.f32 -1.442695, %v711_v14  ;;  %v604_v30 = vadd.f32 %v2370_v51, %v603_v26 }
 0x174   : > { %v2387_v31 = vadd.f32 1.0, %v1728_v27  ;;  %vm2404_vm6 = vcmp.eq.f32.partialorder %v878_v41, 8.507059e+37  ;;  %v881_v60 = vor.u32 1.1754944e-38, %v880_v46 }
 0x175   : > { %v857_v32 = vmul.f32 %v1726_v11, %v856_v28  ;;  %1733 = vpow2.f32 %v1572_v29  ;;  %v697_v33 = vadd.f32 %v2374_v53, %v604_v30 }
 0x176   : > { %1735 = vrcp.f32 %v2387_v31  ;;  %v648_v36 = vpop.f32.mrf.mxu3  ;;  %v1103_v48 = vand.u32 2147483647, %v2387_v31  ;;  %v1105_v55 = vand.u32 2147483648, %v2387_v31  ;;  %vm1099_vm7 = vweird.f32 %v2387_v31 }
 0x177   : > { %v1730_v37 = vpop.eup %1729  ;;  %v858_v38 = vadd.f32 %v1726_v11, %v857_v32  ;;  %v1558_v39 = vmul.f32 -1.442695, %v697_v33  ;;  %v649_v43 = vadd.f32 %v2370_v51, %v648_v36 }
 0x178   : > { %v1732_v40 = vpop.eup %1731  ;;  %v2395_v42 = vadd.f32 1.0, %v1730_v37  ;;  %vm2424_vm9 = vcmp.eq.f32.partialorder %v1103_v48, 8.507059e+37  ;;  %v1106_v7 = vor.u32 1.1754944e-38, %v1105_v55 }
 0x179   : > { %v862_v44 = vsel %vm2390_vm2, %v1726_v11, %v858_v38  ;;  %v870_v45 = vmul.f32 %v1732_v40, %v823_v12  ;;  %1737 = vpow2.f32 %v1558_v39  ;;  %vm875_vm5 = vweird.f32 %v1732_v40 }
 0x17a   : > { %v867_v47 = vsel %vm864_vm3, %v866_v35, %v862_v44  ;;  %1739 = vrcp.f32 %v2395_v42  ;;  %v606_v49 = vpop.f32.mrf.mxu1  ;;  %v712_v0 = vadd.f32 %v2374_v53, %v649_v43  ;;  %vm2420_vm8 = vmor %vm874_vm4, %vm875_vm5  ;;  %v893_v1 = vand.u32 2147483647, %v2395_v42 }
 0x17b   : > { %v1734_v50 = vpop.eup %1733  ;;  %v1334_v52 = vmul.f32 %v867_v47, %v2272_v16  ;;  %v871_v54 = vsub.f32 1.0, %v870_v45  ;;  %v607_v59 = vadd.f32 %v2370_v51, %v606_v49  ;;  %v895_v2 = vand.u32 2147483648, %v2395_v42 }
 0x17c   : > { %v1736_v56 = vpop.eup %1735  ;;  %v2408_v58 = vadd.f32 1.0, %v1734_v50  ;;  %vm889_vm10 = vweird.f32 %v2395_v42  ;;  %v1573_v10 = vmul.f32 -1.442695, %v712_v0  ;;  %vm2441_vm12 = vcmp.eq.f32.partialorder %v893_v1, 8.507059e+37 }
 0x17d   : > { %1366 = vst [vmem:[%s2414_s12] sm:$0xff] %v1334_v52  ;;  %v872_v16 = vmul.f32 %v1732_v40, %v871_v54  ;;  %v1095_v61 = vmul.f32 %v1736_v56, %v2387_v31  ;;  %v698_v11 = vadd.f32 %v2374_v53, %v607_v59  ;;  %vm1100_vm11 = vweird.f32 %v1736_v56 }
 0x17e   : > { %1741 = vrcp.f32 %v2408_v58  ;;  %v651_v3 = vpop.f32.mrf.mxu3  ;;  %v896_v27 = vor.u32 1.1754944e-38, %v895_v2  ;;  %vm1114_vm14 = vweird.f32 %v2408_v58  ;;  %vm1101_vm15 = vmor %vm1099_vm7, %vm1100_vm11  ;;  %v1118_v34 = vand.u32 2147483647, %v2408_v58 }
 0x17f   : > { %v1738_v4 = vpop.eup %1737  ;;  %v873_v5 = vadd.f32 %v1732_v40, %v872_v16  ;;  %v1096_v6 = vsub.f32 1.0, %v1095_v61  ;;  %v652_v12 = vadd.f32 %v2370_v51, %v651_v3  ;;  %v1559_v35 = vmul.f32 -1.442695, %v698_v11 }
 0x180   : > { %v1740_v8 = vpop.eup %1739  ;;  %v2432_v9 = vadd.f32 1.0, %v1738_v4  ;;  %v1120_v39 = vand.u32 2147483648, %v2408_v58  ;;  %vm1119_vm5 = vcmp.eq.f32.partialorder %v1118_v34, 8.507059e+37 }
 0x181   : > { %v877_v13 = vsel %vm2420_vm8, %v1732_v40, %v873_v5  ;;  %v1097_v14 = vmul.f32 %v1736_v56, %v1096_v6  ;;  %v885_v15 = vmul.f32 %v1740_v8, %v2395_v42  ;;  %vm890_vm13 = vweird.f32 %v1740_v8 }
 0x182   : > { %v882_v25 = vsel %vm2404_vm6, %v881_v60, %v877_v13  ;;  %1743 = vrcp.f32 %v2432_v9  ;;  %v609_v28 = vpop.f32.mrf.mxu1  ;;  %v713_v36 = vadd.f32 %v2374_v53, %v652_v12  ;;  %vm2459_vm0 = vmor %vm889_vm10, %vm890_vm13  ;;  %vm904_vm1 = vweird.f32 %v2432_v9 }
 0x183   : > { %v1335_v29 = vmul.f32 %v882_v25, %v2280_v18  ;;  %v1098_v30 = vadd.f32 %v1736_v56, %v1097_v14  ;;  %v886_v32 = vsub.f32 1.0, %v885_v15  ;;  %1745 = vpow2.f32 %v1573_v10 }
 0x184   : > { %v1742_v33 = vpop.eup %1741  ;;  %1747 = vpow2.f32 %v1559_v35  ;;  %v1574_v41 = vmul.f32 -1.442695, %v713_v36  ;;  %v610_v47 = vadd.f32 %v2370_v51, %v609_v28  ;;  %v908_v49 = vand.u32 2147483647, %v2432_v9 }
 0x185   : > { %1367 = vst [vmem:[%s2414_s12 + $0x8] sm:$0xff] %v1335_v29  ;;  %v1102_v37 = vsel %vm1101_vm15, %v1736_v56, %v1098_v30  ;;  %v887_v38 = vmul.f32 %v1740_v8, %v886_v32  ;;  %v1110_v18 = vmul.f32 %v1742_v33, %v2408_v58  ;;  %v910_v42 = vand.u32 2147483648, %v2432_v9 }
 0x186   : > { %v1107_v40 = vsel %vm2424_vm9, %v1106_v7, %v1102_v37  ;;  %v654_v43 = vpop.f32.mrf.mxu3  ;;  %1749 = vpow2.f32 %v1574_v41  ;;  %vm1115_vm2 = vweird.f32 %v1742_v33  ;;  %v699_v57 = vadd.f32 %v2374_v53, %v610_v47 }
 0x187   : > { %v1350_v44 = vmul.f32 %v1107_v40, %v2275_v17  ;;  %v888_v45 = vadd.f32 %v1740_v8, %v887_v38  ;;  %v1111_v46 = vsub.f32 1.0, %v1110_v18  ;;  %v655_v50 = vadd.f32 %v2370_v51, %v654_v43  ;;  %vm1116_vm4 = vmor %vm1114_vm14, %vm1115_vm2 }
 0x188   : > { %v1744_v48 = vpop.eup %1743  ;;  %v1121_v1 = vor.u32 1.1754944e-38, %v1120_v39  ;;  %v1560_v2 = vmul.f32 -1.442695, %v699_v57  ;;  %vm2483_vm6 = vcmp.eq.f32.partialorder %v908_v49, 8.507059e+37  ;;  %v911_v7 = vor.u32 1.1754944e-38, %v910_v42 }
 0x189   : > { %1382 = vst [vmem:[%s2414_s12 + $0x80] sm:$0xff] %v1350_v44  ;;  %v892_v52 = vsel %vm2459_vm0, %v1740_v8, %v888_v45  ;;  %v1112_v54 = vmul.f32 %v1742_v33, %v1111_v46  ;;  %v900_v17 = vmul.f32 %v1744_v48, %v2432_v9  ;;  %v1746_v55 = vpop.eup %1745  ;;  %vm905_vm3 = vweird.f32 %v1744_v48 }
 0x18a   : > { %v897_v56 = vsel %vm2441_vm12, %v896_v27, %v892_v52  ;;  %v714_v0 = vadd.f32 %v2374_v53, %v655_v50  ;;  %v612_v59 = vpop.f32.mrf.mxu1  ;;  %v2478_v62 = vadd.f32 1.0, %v1746_v55  ;;  %v1748_v63 = vpop.eup %1747  ;;  %vm2491_vm7 = vmor %vm904_vm1, %vm905_vm3 }
 0x18b   : > { %v1336_v16 = vmul.f32 %v897_v56, %v2288_v20  ;;  %v1113_v60 = vadd.f32 %v1742_v33, %v1112_v54  ;;  %v901_v61 = vsub.f32 1.0, %v900_v17  ;;  %v2495_v8 = vadd.f32 1.0, %v1748_v63 }
 0x18c   : > { %1751 = vrcp.f32 %v2478_v62  ;;  %v1750_v20 = vpop.eup %1749  ;;  %v1575_v10 = vmul.f32 -1.442695, %v714_v0  ;;  %v1133_v15 = vand.u32 2147483647, %v2478_v62  ;;  %v1135_v25 = vand.u32 2147483648, %v2478_v62 }
 0x18d   : > { %1368 = vst [vmem:[%s2414_s12 + $0x10] sm:$0xff] %v1336_v16  ;;  %v1117_v3 = vsel %vm1116_vm4, %v1742_v33, %v1113_v60  ;;  %v902_v4 = vmul.f32 %v1744_v48, %v901_v61  ;;  %v2498_v14 = vadd.f32 1.0, %v1750_v20  ;;  %1753 = vpow2.f32 %v1560_v2 }
 0x18e   : > { %v1122_v6 = vsel %vm1119_vm5, %v1121_v1, %v1117_v3  ;;  %v657_v11 = vpop.f32.mrf.mxu3  ;;  %1755 = vrcp.f32 %v2495_v8  ;;  %v613_v26 = vadd.f32 %v2370_v51, %v612_v59  ;;  %v923_v30 = vand.u32 2147483647, %v2495_v8 }
 0x18f   : > { %v1351_v12 = vmul.f32 %v1122_v6, %v2283_v19  ;;  %v903_v13 = vadd.f32 %v1744_v48, %v902_v4  ;;  %1757 = vrcp.f32 %v2498_v14  ;;  %vm1129_vm8 = vweird.f32 %v2478_v62 }
 0x190   : > { %1759 = vpow2.f32 %v1575_v10  ;;  %vm2514_vm9 = vcmp.eq.f32.partialorder %v1133_v15, 8.507059e+37  ;;  %v1136_v34 = vor.u32 1.1754944e-38, %v1135_v25  ;;  %vm919_vm10 = vweird.f32 %v2495_v8 }
 0x191   : > { %1383 = vst [vmem:[%s2414_s12 + $0x88] sm:$0xff] %v1351_v12  ;;  %v907_v9 = vsel %vm2491_vm7, %v1744_v48, %v903_v13  ;;  %v925_v36 = vand.u32 2147483648, %v2495_v8  ;;  %v658_v37 = vadd.f32 %v2370_v51, %v657_v11  ;;  %vm1144_vm11 = vweird.f32 %v2498_v14 }
 0x192   : > { %v912_v19 = vsel %vm2483_vm6, %v911_v7, %v907_v9  ;;  %v615_v27 = vpop.f32.mrf.mxu1  ;;  %v1752_v28 = vpop.eup %1751  ;;  %v1148_v39 = vand.u32 2147483647, %v2498_v14  ;;  %v1150_v40 = vand.u32 2147483648, %v2498_v14  ;;  %vm2529_vm12 = vcmp.eq.f32.partialorder %v923_v30, 8.507059e+37 }
 0x193   : > { %v1337_v29 = vmul.f32 %v912_v19, %v2296_v22  ;;  %v1125_v32 = vmul.f32 %v1752_v28, %v2478_v62  ;;  %v1754_v35 = vpop.eup %1753  ;;  %v700_v22 = vadd.f32 %v2374_v53, %v613_v26  ;;  %v715_v47 = vadd.f32 %v2374_v53, %v658_v37 }
 0x194   : > { %v1756_v38 = vpop.eup %1755  ;;  %v2526_v31 = vadd.f32 1.0, %v1754_v35  ;;  %vm1130_vm13 = vweird.f32 %v1752_v28  ;;  %v926_v52 = vor.u32 1.1754944e-38, %v925_v36  ;;  %v616_v54 = vadd.f32 %v2370_v51, %v615_v27 }
 0x195   : > { %1369 = vst [vmem:[%s2414_s12 + $0x18] sm:$0xff] %v1337_v29  ;;  %v1126_v18 = vsub.f32 1.0, %v1125_v32  ;;  %v1758_v43 = vpop.eup %1757  ;;  %v915_v44 = vmul.f32 %v1756_v38, %v2495_v8  ;;  %v1561_v46 = vmul.f32 -1.442695, %v700_v22  ;;  %vm920_vm14 = vweird.f32 %v1756_v38  ;;  %vm1131_vm15 = vmor %vm1129_vm8, %vm1130_vm13 }
 0x196   : > { %v660_v41 = vpop.f32.mrf.mxu3  ;;  %v1140_v49 = vmul.f32 %v1758_v43, %v2498_v14  ;;  %1761 = vrcp.f32 %v2526_v31  ;;  %v1760_v42 = vpop.eup %1759  ;;  %vm2541_vm0 = vcmp.eq.f32.partialorder %v1148_v39, 8.507059e+37  ;;  %v1151_v16 = vor.u32 1.1754944e-38, %v1150_v40  ;;  %vm2547_vm1 = vmor %vm919_vm10, %vm920_vm14 }
 0x197   : > { %v1127_v48 = vmul.f32 %v1752_v28, %v1126_v18  ;;  %v916_v50 = vsub.f32 1.0, %v915_v44  ;;  %v2537_v56 = vadd.f32 1.0, %v1760_v42  ;;  %1763 = vpow2.f32 %v1561_v46  ;;  %v1849_v42 = vld [vmem:[%s2251_s2 + $0x28] sm:$0xff] }
 0x198   : > { %v1141_v55 = vsub.f32 1.0, %v1140_v49  ;;  %v1576_v60 = vmul.f32 -1.442695, %v715_v47  ;;  %vm1145_vm2 = vweird.f32 %v1758_v43  ;;  %vm934_vm3 = vweird.f32 %v2526_v31 }
 0x199   : > { %v1128_v17 = vadd.f32 %v1752_v28, %v1127_v48  ;;  %v917_v0 = vmul.f32 %v1756_v38, %v916_v50  ;;  %1765 = vrcp.f32 %v2537_v56  ;;  %v938_v3 = vand.u32 2147483647, %v2526_v31  ;;  %vm1146_vm4 = vmor %vm1144_vm11, %vm1145_vm2 }
 0x19a   : > { %v618_v57 = vpop.f32.mrf.mxu1  ;;  %v1142_v1 = vmul.f32 %v1758_v43, %v1141_v55  ;;  %1767 = vpow2.f32 %v1576_v60  ;;  %v701_v6 = vadd.f32 %v2374_v53, %v616_v54  ;;  %v940_v10 = vand.u32 2147483648, %v2526_v31 }
 0x19b   : > { %v1132_v61 = vsel %vm1131_vm15, %v1752_v28, %v1128_v17  ;;  %v918_v2 = vadd.f32 %v1756_v38, %v917_v0  ;;  %v1163_v11 = vand.u32 2147483647, %v2537_v56  ;;  %v661_v28 = vadd.f32 %v2370_v51, %v660_v41 }
 0x19c   : > { %v1137_v62 = vsel %vm2514_vm9, %v1136_v34, %v1132_v61  ;;  %v1762_v4 = vpop.eup %1761  ;;  %v1143_v20 = vadd.f32 %v1758_v43, %v1142_v1  ;;  %v1562_v15 = vmul.f32 -1.442695, %v701_v6  ;;  %v619_v29 = vadd.f32 %v2370_v51, %v618_v57 }
 0x19d   : > { %v1352_v5 = vmul.f32 %v1137_v62, %v2291_v21  ;;  %v922_v7 = vsel %vm2547_vm1, %v1756_v38, %v918_v2  ;;  %v930_v8 = vmul.f32 %v1762_v4, %v2526_v31  ;;  %v1764_v12 = vpop.eup %1763  ;;  %vm935_vm5 = vweird.f32 %v1762_v4  ;;  %v1850_v62 = vld [vmem:[%s2251_s2 + $0xa0] sm:$0xff] }
 0x19e   : > { %v663_v58 = vpop.f32.mrf.mxu3  ;;  %v927_v21 = vsel %vm2529_vm12, %v926_v52, %v922_v7  ;;  %v1147_v13 = vsel %vm1146_vm4, %v1758_v43, %v1143_v20  ;;  %v2571_v26 = vadd.f32 1.0, %v1764_v12  ;;  %1769 = vpow2.f32 %v1562_v15  ;;  %vm2583_vm6 = vmor %vm934_vm3, %vm935_vm5 }
 0x19f   : > { %1384 = vst [vmem:[%s2414_s12 + $0x90] sm:$0xff] %v1352_v5  ;;  %v1338_v25 = vmul.f32 %v927_v21, %v2304_v24  ;;  %v1152_v14 = vsel %vm2541_vm0, %v1151_v16, %v1147_v13  ;;  %v931_v9 = vsub.f32 1.0, %v930_v8  ;;  %v1766_v19 = vpop.eup %1765  ;;  %vm2587_vm7 = vcmp.eq.f32.partialorder %v938_v3, 8.507059e+37  ;;  %v1853_v3 = vld [vmem:[%s2251_s2 + $0x38] sm:$0xff] }
 0x1a0   : > { %v1353_v27 = vmul.f32 %v1152_v14, %v2299_v23  ;;  %v1155_v33 = vmul.f32 %v1766_v19, %v2537_v56  ;;  %1771 = vrcp.f32 %v2571_v26  ;;  %v1768_v24 = vpop.eup %1767  ;;  %v941_v35 = vor.u32 1.1754944e-38, %v940_v10  ;;  %v1851_v23 = vld [vmem:[%s2251_s2 + $0x30] sm:$0xff] }
 0x1a1   : > { %1370 = vst [vmem:[%s2414_s12 + $0x20] sm:$0xff] %v1338_v25  ;;  %v932_v32 = vmul.f32 %v1762_v4, %v931_v9  ;;  %v716_v36 = vadd.f32 %v2374_v53, %v661_v28  ;;  %v2592_v38 = vadd.f32 1.0, %v1768_v24  ;;  %v702_v18 = vadd.f32 %v2374_v53, %v619_v29 }
 0x1a2   : > { %v621_v30 = vpop.f32.mrf.mxu1  ;;  %1385 = vst [vmem:[%s2414_s12 + $0x98] sm:$0xff] %v1353_v27  ;;  %v1156_v37 = vsub.f32 1.0, %v1155_v33  ;;  %vm1159_vm8 = vweird.f32 %v2537_v56  ;;  %vm2596_vm9 = vcmp.eq.f32.partialorder %v1163_v11, 8.507059e+37  ;;  %v1165_v40 = vand.u32 2147483648, %v2537_v56 }
 0x1a3   : > { %v933_v22 = vadd.f32 %v1762_v4, %v932_v32  ;;  %v1577_v31 = vmul.f32 -1.442695, %v716_v36  ;;  %vm1160_vm10 = vweird.f32 %v1766_v19  ;;  %1773 = vrcp.f32 %v2592_v38 }
 0x1a4   : > { %v1157_v44 = vmul.f32 %v1766_v19, %v1156_v37  ;;  %v1770_v45 = vpop.eup %1769  ;;  %v953_v47 = vand.u32 2147483647, %v2571_v26  ;;  %v664_v48 = vadd.f32 %v2370_v51, %v663_v58  ;;  %v1563_v17 = vmul.f32 -1.442695, %v702_v18  ;;  %vm1161_vm11 = vmor %vm1159_vm8, %vm1160_vm10 }
 0x1a5   : > { %v937_v43 = vsel %vm2583_vm6, %v1762_v4, %v933_v22  ;;  %1775 = vpow2.f32 %v1577_v31  ;;  %v2609_v54 = vadd.f32 1.0, %v1770_v45  ;;  %v1166_v55 = vor.u32 1.1754944e-38, %v1165_v40 }
 0x1a6   : > { %v666_v41 = vpop.f32.mrf.mxu3  ;;  %v942_v46 = vsel %vm2587_vm7, %v941_v35, %v937_v43  ;;  %v1772_v49 = vpop.eup %1771  ;;  %v1158_v52 = vadd.f32 %v1766_v19, %v1157_v44  ;;  %vm949_vm12 = vweird.f32 %v2571_v26  ;;  %v955_v0 = vand.u32 2147483648, %v2571_v26 }
 0x1a7   : > { %v1339_v50 = vmul.f32 %v1849_v42, %v942_v46  ;;  %v945_v57 = vmul.f32 %v1772_v49, %v2571_v26  ;;  %v1178_v16 = vand.u32 2147483647, %v2592_v38  ;;  %v1180_v60 = vand.u32 2147483648, %v2592_v38 }
 0x1a8   : > { %v1162_v59 = vsel %vm1161_vm11, %v1766_v19, %v1158_v52  ;;  %1777 = vrcp.f32 %v2609_v54  ;;  %vm950_vm13 = vweird.f32 %v1772_v49  ;;  %vm2623_vm14 = vcmp.eq.f32.partialorder %v953_v47, 8.507059e+37 }
 0x1a9   : > { %1371 = vst [vmem:[%s2414_s12 + $0x28] sm:$0xff] %v1339_v50  ;;  %v1167_v56 = vsel %vm2596_vm9, %v1166_v55, %v1162_v59  ;;  %v946_v63 = vsub.f32 1.0, %v945_v57  ;;  %1779 = vpow2.f32 %v1563_v17  ;;  %v1774_v1 = vpop.eup %1773  ;;  %v717_v4 = vadd.f32 %v2374_v53, %v664_v48  ;;  %vm2635_vm0 = vmor %vm949_vm12, %vm950_vm13  ;;  %v1852_v50 = vld [vmem:[%s2251_s2 + $0xa8] sm:$0xff] }
 0x1aa   : > { %v624_v61 = vpop.f32.mrf.mxu1  ;;  %v1354_v2 = vmul.f32 %v1850_v62, %v1167_v56  ;;  %v622_v5 = vadd.f32 %v2370_v51, %v621_v30  ;;  %v956_v58 = vor.u32 1.1754944e-38, %v955_v0  ;;  %v1170_v7 = vmul.f32 %v1774_v1, %v2592_v38 }
 0x1ab   : > { %v1776_v20 = vpop.eup %1775  ;;  %v947_v6 = vmul.f32 %v1772_v49, %v946_v63  ;;  %vm1174_vm15 = vweird.f32 %v2592_v38  ;;  %vm2639_vm1 = vcmp.eq.f32.partialorder %v1178_v16, 8.507059e+37  ;;  %v1181_v12 = vor.u32 1.1754944e-38, %v1180_v60 }
 0x1ac   : > { %1386 = vst [vmem:[%s2414_s12 + $0xa0] sm:$0xff] %v1354_v2  ;;  %vm964_vm2 = vweird.f32 %v2609_v54  ;;  %v2644_v21 = vadd.f32 1.0, %v1776_v20  ;;  %v1171_v15 = vsub.f32 1.0, %v1170_v7  ;;  %v968_v25 = vand.u32 2147483647, %v2609_v54 }
 0x1ad   : > { %v948_v13 = vadd.f32 %v1772_v49, %v947_v6  ;;  %v1578_v14 = vmul.f32 -1.442695, %v717_v4  ;;  %vm1175_vm3 = vweird.f32 %v1774_v1  ;;  %v970_v26 = vand.u32 2147483648, %v2609_v54 }
 0x1ae   : > { %v669_v8 = vpop.f32.mrf.mxu3  ;;  %v1778_v9 = vpop.eup %1777  ;;  %1781 = vrcp.f32 %v2644_v21  ;;  %v703_v19 = vadd.f32 %v2374_v53, %v622_v5  ;;  %v1172_v29 = vmul.f32 %v1774_v1, %v1171_v15  ;;  %v667_v32 = vadd.f32 %v2370_v51, %v666_v41  ;;  %vm1176_vm5 = vmor %vm1174_vm15, %vm1175_vm3 }
 0x1af   : > { %v1780_v27 = vpop.eup %1779  ;;  %v952_v28 = vsel %vm2635_vm0, %v1772_v49, %v948_v13  ;;  %v960_v30 = vmul.f32 %v1778_v9, %v2609_v54  ;;  %vm965_vm4 = vweird.f32 %v1778_v9  ;;  %v625_v34 = vadd.f32 %v2370_v51, %v624_v61 }
 0x1b0   : > { %v957_v33 = vsel %vm2623_vm14, %v956_v58, %v952_v28  ;;  %v2656_v24 = vadd.f32 1.0, %v1780_v27  ;;  %v1173_v36 = vadd.f32 %v1774_v1, %v1172_v29  ;;  %1783 = vpow2.f32 %v1578_v14  ;;  %vm2677_vm8 = vmor %vm964_vm2, %vm965_vm4 }
 0x1b1   : > { %v1340_v35 = vmul.f32 %v1851_v23, %v957_v33  ;;  %v961_v22 = vsub.f32 1.0, %v960_v30  ;;  %vm2663_vm6 = vcmp.eq.f32.partialorder %v968_v25, 8.507059e+37  ;;  %v971_v18 = vor.u32 1.1754944e-38, %v970_v26  ;;  %v1854_v33 = vld [vmem:[%s2251_s2 + $0xb0] sm:$0xff] }
 0x1b2   : > { %1785 = vrcp.f32 %v2656_v24  ;;  %v670_v39 = vadd.f32 %v2370_v51, %v669_v8  ;;  %v627_v40 = vpop.f32.mrf.mxu1  ;;  %v1177_v31 = vsel %vm1176_vm5, %v1774_v1, %v1173_v36  ;;  %vm1189_vm7 = vweird.f32 %v2644_v21 }
 0x1b3   : > { %1372 = vst [vmem:[%s2414_s12 + $0x30] sm:$0xff] %v1340_v35  ;;  %v962_v41 = vmul.f32 %v1778_v9, %v961_v22  ;;  %v1564_v43 = vmul.f32 -1.442695, %v703_v19  ;;  %v718_v38 = vadd.f32 %v2374_v53, %v667_v32  ;;  %v1182_v46 = vsel %vm2639_vm1, %v1181_v12, %v1177_v31 }
 0x1b4   : > { %v1782_v45 = vpop.eup %1781  ;;  %v1193_v48 = vand.u32 2147483647, %v2644_v21  ;;  %v1195_v49 = vand.u32 2147483648, %v2644_v21  ;;  %v704_v42 = vadd.f32 %v2374_v53, %v625_v34  ;;  %v1355_v52 = vmul.f32 %v1852_v50, %v1182_v46 }
 0x1b5   : > { %v963_v17 = vadd.f32 %v1778_v9, %v962_v41  ;;  %v1185_v55 = vmul.f32 %v1782_v45, %v2644_v21  ;;  %vm979_vm9 = vweird.f32 %v2656_v24  ;;  %1787 = vpow2.f32 %v1564_v43  ;;  %v1855_v43 = vld [vmem:[%s2251_s2 + $0x40] sm:$0xff] }
 0x1b6   : > { %v672_v44 = vpop.f32.mrf.mxu3  ;;  %v1579_v54 = vmul.f32 -1.442695, %v718_v38  ;;  %v1565_v57 = vmul.f32 -1.442695, %v704_v42  ;;  %v719_v0 = vadd.f32 %v2374_v53, %v670_v39  ;;  %v1784_v59 = vpop.eup %1783  ;;  %1387 = vst [vmem:[%s2414_s12 + $0xa8] sm:$0xff] %v1355_v52  ;;  %v628_v61 = vadd.f32 %v2370_v51, %v627_v40 }
 0x1b7   : > { %v967_v16 = vsel %vm2677_vm8, %v1778_v9, %v963_v17  ;;  %v1186_v60 = vsub.f32 1.0, %v1185_v55  ;;  %v673_v56 = vadd.f32 %v2370_v51, %v672_v44  ;;  %v2695_v62 = vadd.f32 1.0, %v1784_v59 }
 0x1b8   : > { %v1786_v63 = vpop.eup %1785  ;;  %v972_v1 = vsel %vm2663_vm6, %v971_v18, %v967_v16  ;;  %1789 = vpow2.f32 %v1579_v54  ;;  %v1580_v2 = vmul.f32 -1.442695, %v719_v0  ;;  %vm1190_vm10 = vweird.f32 %v1782_v45 }
 0x1b9   : > { %v1341_v4 = vmul.f32 %v1853_v3, %v972_v1  ;;  %v1187_v5 = vmul.f32 %v1782_v45, %v1186_v60  ;;  %v975_v20 = vmul.f32 %v1786_v63, %v2656_v24  ;;  %vm980_vm11 = vweird.f32 %v1786_v63  ;;  %vm1191_vm12 = vmor %vm1189_vm7, %vm1190_vm10 }
 0x1ba   : > { %v983_v6 = vand.u32 2147483647, %v2656_v24  ;;  %v985_v58 = vand.u32 2147483648, %v2656_v24  ;;  %1791 = vrcp.f32 %v2695_v62  ;;  %v705_v10 = vadd.f32 %v2374_v53, %v628_v61  ;;  %v630_v25 = vpop.f32.mrf.mxu1  ;;  %vm2712_vm14 = vmor %vm979_vm9, %vm980_vm11 }
 0x1bb   : > { %1373 = vst [vmem:[%s2414_s12 + $0x38] sm:$0xff] %v1341_v4  ;;  %v1188_v7 = vadd.f32 %v1782_v45, %v1187_v5  ;;  %v976_v8 = vsub.f32 1.0, %v975_v20  ;;  %1793 = vpow2.f32 %v1565_v57  ;;  %v1788_v12 = vpop.eup %1787  ;;  %vm1194_vm13 = vcmp.eq.f32.partialorder %v1193_v48, 8.507059e+37 }
 0x1bc   : > { %v1196_v13 = vor.u32 1.1754944e-38, %v1195_v49  ;;  %1795 = vpow2.f32 %v1580_v2  ;;  %v720_v15 = vadd.f32 %v2374_v53, %v673_v56  ;;  %v2707_v26 = vadd.f32 1.0, %v1788_v12 }
 0x1bd   : > { %v1192_v14 = vsel %vm1191_vm12, %v1782_v45, %v1188_v7  ;;  %v977_v9 = vmul.f32 %v1786_v63, %v976_v8  ;;  %v1566_v19 = vmul.f32 -1.442695, %v705_v10  ;;  %v986_v29 = vor.u32 1.1754944e-38, %v985_v58  ;;  %v1856_v10 = vld [vmem:[%s2251_s2 + $0xb8] sm:$0xff] }
 0x1be   : > { %v675_v11 = vpop.f32.mrf.mxu3  ;;  %v1790_v27 = vpop.eup %1789  ;;  %v1197_v28 = vsel %vm1194_vm13, %v1196_v13, %v1192_v14  ;;  %v1208_v30 = vand.u32 2147483647, %v2695_v62  ;;  %v1210_v32 = vand.u32 2147483648, %v2695_v62  ;;  %vm984_vm15 = vcmp.eq.f32.partialorder %v983_v6, 8.507059e+37 }
 0x1bf   : > { %v1356_v34 = vmul.f32 %v1854_v33, %v1197_v28  ;;  %v978_v23 = vadd.f32 %v1786_v63, %v977_v9  ;;  %1797 = vrcp.f32 %v2707_v26  ;;  %v2720_v36 = vadd.f32 1.0, %v1790_v27 }
 0x1c0   : > { %v1792_v35 = vpop.eup %1791  ;;  %v1581_v24 = vmul.f32 -1.442695, %v720_v15  ;;  %vm1204_vm0 = vweird.f32 %v2695_v62  ;;  %1799 = vpow2.f32 %v1566_v19  ;;  %vm2727_vm1 = vcmp.eq.f32.partialorder %v1208_v30, 8.507059e+37 }
 0x1c1   : > { %v1794_v22 = vpop.eup %1793  ;;  %1388 = vst [vmem:[%s2414_s12 + $0xb0] sm:$0xff] %v1356_v34  ;;  %v982_v37 = vsel %vm2712_vm14, %v1786_v63, %v978_v23  ;;  %v1200_v18 = vmul.f32 %v1792_v35, %v2695_v62  ;;  %v1211_v41 = vor.u32 1.1754944e-38, %v1210_v32  ;;  %1801 = vrcp.f32 %v2720_v36 }
 0x1c2   : > { %v1796_v39 = vpop.eup %1795  ;;  %v987_v40 = vsel %vm984_vm15, %v986_v29, %v982_v37  ;;  %v998_v45 = vand.u32 2147483647, %v2707_v26  ;;  %v1000_v46 = vand.u32 2147483648, %v2707_v26  ;;  %v2735_v47 = vadd.f32 1.0, %v1794_v22  ;;  %v633_v0 = vpop.f32.mrf.mxu1 }
 0x1c3   : > { %v1342_v38 = vmul.f32 %v1855_v43, %v987_v40  ;;  %v1201_v44 = vsub.f32 1.0, %v1200_v18  ;;  %v2737_v48 = vadd.f32 1.0, %v1796_v39  ;;  %1803 = vpow2.f32 %v1581_v24 }
 0x1c4   : > { %v631_v49 = vadd.f32 %v2370_v51, %v630_v25  ;;  %vm1205_vm2 = vweird.f32 %v1792_v35  ;;  %v1223_v52 = vand.u32 2147483647, %v2720_v36  ;;  %v676_v17 = vadd.f32 %v2370_v51, %v675_v11 }
 0x1c5   : > { %v1798_v42 = vpop.eup %1797  ;;  %1374 = vst [vmem:[%s2414_s12 + $0x40] sm:$0xff] %v1342_v38  ;;  %v1202_v50 = vmul.f32 %v1792_v35, %v1201_v44  ;;  %vm994_vm3 = vweird.f32 %v2707_v26  ;;  %v1225_v57 = vand.u32 2147483648, %v2720_v36  ;;  %1805 = vrcp.f32 %v2735_v47  ;;  %vm1206_vm6 = vmor %vm1204_vm0, %vm1205_vm2 }
 0x1c6   : > { %v2743_v55 = vpop.f32.mrf.mxu3  ;;  %v990_v54 = vmul.f32 %v1798_v42, %v2707_v26  ;;  %v1800_v59 = vpop.eup %1799  ;;  %vm2749_vm4 = vcmp.eq.f32.partialorder %v998_v45, 8.507059e+37  ;;  %v1001_v61 = vor.u32 1.1754944e-38, %v1000_v46  ;;  %vm1219_vm5 = vweird.f32 %v2720_v36  ;;  %v1858_v45 = vld [vmem:[%s2251_s2 + $0xc0] sm:$0xff] }
 0x1c7   : > { %v1203_v16 = vadd.f32 %v1792_v35, %v1202_v50  ;;  %v1802_v56 = vpop.eup %1801  ;;  %vm995_vm7 = vweird.f32 %v1798_v42  ;;  %1807 = vrcp.f32 %v2737_v48  ;;  %v706_v1 = vadd.f32 %v2374_v53, %v631_v49 }
 0x1c8   : > { %v991_v63 = vsub.f32 1.0, %v990_v54  ;;  %v1215_v3 = vmul.f32 %v1802_v56, %v2720_v36  ;;  %vm2760_vm8 = vcmp.eq.f32.partialorder %v1223_v52, 8.507059e+37  ;;  %v1013_v5 = vand.u32 2147483647, %v2735_v47  ;;  %vm2773_vm9 = vmor %vm994_vm3, %vm995_vm7  ;;  %v2830_v54 = vld [vmem:[%s3064_s5] ss:$0 sm:$0xff] }
 0x1c9   : > { %v1207_v2 = vsel %vm1206_vm6, %v1792_v35, %v1203_v16  ;;  %v721_v20 = vadd.f32 %v2374_v53, %v676_v17  ;;  %v1804_v62 = vpop.eup %1803  ;;  %v1226_v7 = vor.u32 1.1754944e-38, %v1225_v57  ;;  %v634_v8 = vadd.f32 %v2370_v51, %v633_v0  ;;  %v1857_v35 = vld [vmem:[%s2251_s2 + $0x48] sm:$0xff] }
 0x1ca   : > { %v1212_v6 = vsel %vm2727_vm1, %v1211_v41, %v1207_v2  ;;  %v992_v58 = vmul.f32 %v1798_v42, %v991_v63  ;;  %v1216_v13 = vsub.f32 1.0, %v1215_v3  ;;  %vm1009_vm10 = vweird.f32 %v2735_v47  ;;  %v636_v39 = vpop.f32.mrf.mxu1  ;;  %v1861_v63 = vld [vmem:[%s2251_s2 + $0x50] sm:$0xff] }
 0x1cb   : > { %v1357_v11 = vmul.f32 %v1856_v10, %v1212_v6  ;;  %v2778_v53 = vadd.f32 1.0, %v1800_v59  ;;  %v1806_v15 = vpop.eup %1805  ;;  %vm1220_vm11 = vweird.f32 %v1802_v56  ;;  %v1015_v14 = vand.u32 2147483648, %v2735_v47 }
 0x1cc   : > { %v993_v25 = vadd.f32 %v1798_v42, %v992_v58  ;;  %v1238_v51 = vand.u32 2147483647, %v2737_v48  ;;  %v1217_v9 = vmul.f32 %v1802_v56, %v1216_v13  ;;  %v1005_v26 = vmul.f32 %v1806_v15, %v2735_v47  ;;  %vm1221_vm15 = vmor %vm1219_vm5, %vm1220_vm11  ;;  %v2824_v47 = vld [vmem:[%s314_s10] ss:$0 sm:$0xff]  ;;  %s2014_s10 = scalar_lea.hbm %s3065_s6, 512 }
 0x1cd   : > { %1389 = vst [vmem:[%s2414_s12 + $0xb8] sm:$0xff] %v1357_v11  ;;  %vm2784_vm12 = vcmp.eq.f32.partialorder %v1013_v5, 8.507059e+37  ;;  %vm1234_vm13 = vweird.f32 %v2737_v48  ;;  %v2789_v27 = vadd.f32 1.0, %v1804_v62  ;;  %v1808_v28 = vpop.eup %1807  ;;  %vm1010_vm14 = vweird.f32 %v1806_v15  ;;  %p2016_p12 = scmp.lt.s32.totalorder %s2014_s10, %s2010_s20 }
 0x1ce   : > { %v997_v21 = vsel %vm2773_vm9, %v1798_v42, %v993_v25  ;;  %v1240_v29 = vand.u32 2147483648, %v2737_v48  ;;  %1809 = vrcp.f32 %v2778_v53  ;;  %v1218_v32 = vadd.f32 %v1802_v56, %v1217_v9  ;;  %v2798_v23 = vpop.f32.mrf.mxu3  ;;  %vm2815_vm1 = vmor %vm1009_vm10, %vm1010_vm14 }
 0x1cf   : > { %v1002_v30 = vsel %vm2749_vm4, %v1001_v61, %v997_v21  ;;  %v1006_v33 = vsub.f32 1.0, %v1005_v26  ;;  %v1230_v34 = vmul.f32 %v1808_v28, %v2737_v48  ;;  %v1016_v22 = vor.u32 1.1754944e-38, %v1015_v14  ;;  %v1862_v48 = vld [vmem:[%s2251_s2 + $0xc8] sm:$0xff]  ;;  %p2017_p13 = por %p2016_p12, %p2015_p10 }
 0x1d0   : > { %v1343_v24 = vmul.f32 %v1857_v35, %v1002_v30  ;;  %vm2804_vm0 = vcmp.eq.f32.partialorder %v1238_v51, 8.507059e+37  ;;  %v1567_v18 = vmul.f32 -1.442695, %v706_v1  ;;  %v1222_v40 = vsel %vm1221_vm15, %v1802_v56, %v1218_v32 }
 0x1d1   : > { %v1007_v31 = vmul.f32 %v1806_v15, %v1006_v33  ;;  %v1231_v41 = vsub.f32 1.0, %v1230_v34  ;;  %1811 = vrcp.f32 %v2789_v27  ;;  %v1227_v43 = vsel %vm2760_vm8, %v1226_v7, %v1222_v40  ;;  %p2018_p0 = pnand %p2017_p13, %p2013_p8 }
 0x1d2   : > { %1375 = vst [vmem:[%s2414_s12 + $0x48] sm:$0xff] %v1343_v24  ;;  %v1241_v38 = vor.u32 1.1754944e-38, %v1240_v29  ;;  %vm1024_vm2 = vweird.f32 %v2778_v53  ;;  %v1582_v44 = vmul.f32 -1.442695, %v721_v20  ;;  %v1358_v46 = vmul.f32 %v1858_v45, %v1227_v43  ;;  %v639_v51 = vpop.f32.mrf.mxu1 }
 0x1d3   : > { %v1008_v49 = vadd.f32 %v1806_v15, %v1007_v31  ;;  %v1232_v42 = vmul.f32 %v1808_v28, %v1231_v41  ;;  %vm1235_vm3 = vweird.f32 %v1808_v28  ;;  %v1028_v52 = vand.u32 2147483647, %v2778_v53 }
 0x1d4   : > { %v1810_v50 = vpop.eup %1809  ;;  %1813 = vpow2.f32 %v1567_v18  ;;  %v707_v17 = vadd.f32 %v2824_v47, %v634_v8  ;;  %v679_v57 = vadd.f32 %v2830_v54, %v2743_v55  ;;  %1390 = vst [vmem:[%s2414_s12 + $0xc0] sm:$0xff] %v1358_v46  ;;  %v1030_v60 = vand.u32 2147483648, %v2778_v53  ;;  %vm1236_vm4 = vmor %vm1234_vm13, %vm1235_vm3 }
 0x1d5   : > { %v1012_v0 = vsel %vm2815_vm1, %v1806_v15, %v1008_v49  ;;  %v1233_v59 = vadd.f32 %v1808_v28, %v1232_v42  ;;  %v1020_v16 = vmul.f32 %v1810_v50, %v2778_v53  ;;  %vm1025_vm5 = vweird.f32 %v1810_v50 }
 0x1d6   : > { %v1017_v61 = vsel %vm2784_vm12, %v1016_v22, %v1012_v0  ;;  %1815 = vpow2.f32 %v1582_v44  ;;  %v1568_v55 = vmul.f32 -1.442695, %v707_v17  ;;  %v722_v4 = vadd.f32 %v2824_v47, %v679_v57  ;;  %v684_v10 = vpop.f32.mrf.mxu3  ;;  %vm2855_vm6 = vmor %vm1024_vm2, %vm1025_vm5  ;;  %v1863_v22 = vld [vmem:[%s2251_s2 + $0x58] sm:$0xff]  ;;  %v1868_v0 = vld [vmem:[%s2251_s2 + $0xe0] sm:$0xff] }
 0x1d7   : > { %v1812_v56 = vpop.eup %1811  ;;  %v1344_v1 = vmul.f32 %v1861_v63, %v1017_v61  ;;  %v1237_v2 = vsel %vm1236_vm4, %v1808_v28, %v1233_v59  ;;  %v1021_v3 = vsub.f32 1.0, %v1020_v16  ;;  %v1253_v62 = vand.u32 2147483647, %v2789_v27 }
 0x1d8   : > { %v1242_v5 = vsel %vm2804_vm0, %v1241_v38, %v1237_v2  ;;  %v1245_v20 = vmul.f32 %v1812_v56, %v2789_v27  ;;  %1817 = vpow2.f32 %v1568_v55  ;;  %v1583_v7 = vmul.f32 -1.442695, %v722_v4  ;;  %v1864_v38 = vld [vmem:[%s2251_s2 + $0xd0] sm:$0xff] }
 0x1d9   : > { %1376 = vst [vmem:[%s2414_s12 + $0x50] sm:$0xff] %v1344_v1  ;;  %v1359_v6 = vmul.f32 %v1862_v48, %v1242_v5  ;;  %v1022_v58 = vmul.f32 %v1810_v50, %v1021_v3  ;;  %v637_v8 = vadd.f32 %v2830_v54, %v636_v39  ;;  %vm2859_vm7 = vcmp.eq.f32.partialorder %v1028_v52, 8.507059e+37 }
 0x1da   : > { %v1814_v11 = vpop.eup %1813  ;;  %v1031_v15 = vor.u32 1.1754944e-38, %v1030_v60  ;;  %v1246_v25 = vsub.f32 1.0, %v1245_v20  ;;  %v1255_v14 = vand.u32 2147483648, %v2789_v27  ;;  %1819 = vpow2.f32 %v1583_v7 }
 0x1db   : > { %1391 = vst [vmem:[%s2414_s12 + $0xc8] sm:$0xff] %v1359_v6  ;;  %v1023_v9 = vadd.f32 %v1810_v50, %v1022_v58  ;;  %v2865_v26 = vadd.f32 1.0, %v1814_v11  ;;  %v708_v53 = vadd.f32 %v2824_v47, %v637_v8  ;;  %vm1249_vm8 = vweird.f32 %v2789_v27 }
 0x1dc   : > { %v1816_v19 = vpop.eup %1815  ;;  %v1247_v28 = vmul.f32 %v1812_v56, %v1246_v25  ;;  %vm1250_vm9 = vweird.f32 %v1812_v56  ;;  %vm2869_vm10 = vcmp.eq.f32.partialorder %v1253_v62, 8.507059e+37  ;;  %v682_v30 = vadd.f32 %v2830_v54, %v2798_v23 }
 0x1dd   : > { %v1027_v29 = vsel %vm2855_vm6, %v1810_v50, %v1023_v9  ;;  %1821 = vrcp.f32 %v2865_v26  ;;  %v640_v32 = vadd.f32 %v2830_v54, %v639_v51  ;;  %v2881_v35 = vadd.f32 1.0, %v1816_v19  ;;  %vm1251_vm11 = vmor %vm1249_vm8, %vm1250_vm9 }
 0x1de   : > { %v1818_v33 = vpop.eup %1817  ;;  %v1032_v27 = vsel %vm2859_vm7, %v1031_v15, %v1027_v29  ;;  %v1248_v34 = vadd.f32 %v1812_v56, %v1247_v28  ;;  %v685_v24 = vadd.f32 %v2830_v54, %v684_v10  ;;  %v1256_v18 = vor.u32 1.1754944e-38, %v1255_v14  ;;  %v687_v17 = vpop.f32.mrf.mxu3  ;;  %v1865_v29 = vld [vmem:[%s2251_s2 + $0x60] sm:$0xff] }
 0x1df   : > { %v1345_v37 = vmul.f32 %v1863_v22, %v1032_v27  ;;  %v2885_v39 = vadd.f32 1.0, %v1818_v33  ;;  %v1569_v23 = vmul.f32 -1.442695, %v708_v53  ;;  %v1043_v31 = vand.u32 2147483647, %v2865_v26 }
 0x1e0   : > { %v1252_v40 = vsel %vm1251_vm11, %v1812_v56, %v1248_v34  ;;  %v1045_v41 = vand.u32 2147483648, %v2865_v26  ;;  %1823 = vrcp.f32 %v2881_v35  ;;  %v1820_v43 = vpop.eup %1819  ;;  %v723_v45 = vadd.f32 %v2824_v47, %v682_v30 }
 0x1e1   : > { %1377 = vst [vmem:[%s2414_s12 + $0x58] sm:$0xff] %v1345_v37  ;;  %v1257_v36 = vsel %vm2869_vm10, %v1256_v18, %v1252_v40  ;;  %1825 = vrcp.f32 %v2885_v39  ;;  %v709_v46 = vadd.f32 %v2824_v47, %v640_v32  ;;  %v724_v49 = vadd.f32 %v2824_v47, %v685_v24  ;;  %v1866_v40 = vld [vmem:[%s2251_s2 + $0xd8] sm:$0xff] }
 0x1e2   : > { %v1360_v44 = vmul.f32 %v1864_v38, %v1257_v36  ;;  %vm1039_vm12 = vweird.f32 %v2865_v26  ;;  %v1268_v50 = vand.u32 2147483647, %v2881_v35  ;;  %v2900_v52 = vadd.f32 1.0, %v1820_v43  ;;  %v1867_v43 = vld [vmem:[%s2251_s2 + $0x68] sm:$0xff] }
 0x1e3   : > { %v1822_v42 = vpop.eup %1821  ;;  %1827 = vpow2.f32 %v1569_v23  ;;  %vm2904_vm13 = vcmp.eq.f32.partialorder %v1043_v31, 8.507059e+37  ;;  %v1046_v59 = vor.u32 1.1754944e-38, %v1045_v41  ;;  %v1270_v16 = vand.u32 2147483648, %v2881_v35 }
 0x1e4   : > { %1392 = vst [vmem:[%s2414_s12 + $0xd0] sm:$0xff] %v1360_v44  ;;  %v1035_v57 = vmul.f32 %v1822_v42, %v2865_v26  ;;  %vm1040_vm14 = vweird.f32 %v1822_v42  ;;  %vm1264_vm15 = vweird.f32 %v2881_v35  ;;  %vm1054_vm0 = vweird.f32 %v2885_v39 }
 0x1e5   : > { %1829 = vrcp.f32 %v2900_v52  ;;  %v1584_v55 = vmul.f32 -1.442695, %v723_v45  ;;  %v1570_v56 = vmul.f32 -1.442695, %v709_v46  ;;  %v688_v63 = vadd.f32 %v2830_v54, %v687_v17  ;;  %vm2924_vm2 = vmor %vm1039_vm12, %vm1040_vm14 }
 0x1e6   : > { %v1824_v60 = vpop.eup %1823  ;;  %v1036_v61 = vsub.f32 1.0, %v1035_v57  ;;  %vm2914_vm1 = vcmp.eq.f32.partialorder %v1268_v50, 8.507059e+37  ;;  %v1058_v4 = vand.u32 2147483647, %v2885_v39  ;;  %v1060_v5 = vand.u32 2147483648, %v2885_v39 }
 0x1e7   : > { %v1826_v1 = vpop.eup %1825  ;;  %v1260_v2 = vmul.f32 %v1824_v60, %v2881_v35  ;;  %v1271_v62 = vor.u32 1.1754944e-38, %v1270_v16  ;;  %1831 = vpow2.f32 %v1584_v55  ;;  %v1585_v7 = vmul.f32 -1.442695, %v724_v49 }
 0x1e8   : > { %v1037_v20 = vmul.f32 %v1822_v42, %v1036_v61  ;;  %v1050_v48 = vmul.f32 %v1826_v1, %v2885_v39  ;;  %vm1055_vm3 = vweird.f32 %v1826_v1  ;;  %v725_v8 = vadd.f32 %v2824_v47, %v688_v63 }
 0x1e9   : > { %v1828_v6 = vpop.eup %1827  ;;  %v1261_v58 = vsub.f32 1.0, %v1260_v2  ;;  %1833 = vpow2.f32 %v1570_v56  ;;  %vm1265_vm4 = vweird.f32 %v1824_v60  ;;  %vm2931_vm5 = vcmp.eq.f32.partialorder %v1058_v4, 8.507059e+37  ;;  %vm2943_vm6 = vmor %vm1054_vm0, %vm1055_vm3 }
 0x1ea   : > { %v1038_v10 = vadd.f32 %v1822_v42, %v1037_v20  ;;  %v1051_v11 = vsub.f32 1.0, %v1050_v48  ;;  %v2929_v12 = vadd.f32 1.0, %v1828_v6  ;;  %1835 = vpow2.f32 %v1585_v7  ;;  %vm1266_vm7 = vmor %vm1264_vm15, %vm1265_vm4 }
 0x1eb   : > { %v1830_v13 = vpop.eup %1829  ;;  %v1262_v15 = vmul.f32 %v1824_v60, %v1261_v58  ;;  %v1586_v9 = vmul.f32 -1.442695, %v725_v8  ;;  %v1061_v28 = vor.u32 1.1754944e-38, %v1060_v5  ;;  %v1283_v27 = vand.u32 2147483647, %v2900_v52 }
 0x1ec   : > { %v1042_v14 = vsel %vm2924_vm2, %v1822_v42, %v1038_v10  ;;  %v1052_v51 = vmul.f32 %v1826_v1, %v1051_v11  ;;  %v1275_v47 = vmul.f32 %v1830_v13, %v2900_v52  ;;  %1837 = vrcp.f32 %v2929_v12  ;;  %v1869_v11 = vld [vmem:[%s2251_s2 + $0x70] sm:$0xff] }
 0x1ed   : > { %v1047_v26 = vsel %vm2904_vm13, %v1046_v59, %v1042_v14  ;;  %v1263_v53 = vadd.f32 %v1824_v60, %v1262_v15  ;;  %v1832_v21 = vpop.eup %1831  ;;  %vm1280_vm8 = vweird.f32 %v1830_v13  ;;  %v1285_v24 = vand.u32 2147483648, %v2900_v52 }
 0x1ee   : > { %v1346_v30 = vmul.f32 %v1865_v29, %v1047_v26  ;;  %v1053_v32 = vadd.f32 %v1826_v1, %v1052_v51  ;;  %v1276_v33 = vsub.f32 1.0, %v1275_v47  ;;  %v2954_v22 = vadd.f32 1.0, %v1832_v21 }
 0x1ef   : > { %v1267_v34 = vsel %vm1266_vm7, %v1824_v60, %v1263_v53  ;;  %v1834_v37 = vpop.eup %1833  ;;  %1839 = vpow2.f32 %v1586_v9  ;;  %vm1279_vm9 = vweird.f32 %v2900_v52  ;;  %v1286_v45 = vor.u32 1.1754944e-38, %v1285_v24 }
 0x1f0   : > { %1378 = vst [vmem:[%s2414_s12 + $0x60] sm:$0xff] %v1346_v30  ;;  %v1272_v18 = vsel %vm2914_vm1, %v1271_v62, %v1267_v34  ;;  %v1057_v35 = vsel %vm2943_vm6, %v1826_v1, %v1053_v32  ;;  %v1277_v39 = vmul.f32 %v1830_v13, %v1276_v33  ;;  %v1836_v23 = vpop.eup %1835  ;;  %1841 = vrcp.f32 %v2954_v22  ;;  %vm1281_vm10 = vmor %vm1279_vm9, %vm1280_vm8  ;;  %v1870_v30 = vld [vmem:[%s2251_s2 + $0xe8] sm:$0xff] }
 0x1f1   : > { %v1361_v31 = vmul.f32 %v1866_v40, %v1272_v18  ;;  %v1062_v41 = vsel %vm2931_vm5, %v1061_v28, %v1057_v35  ;;  %v837_v46 = vadd.f32 1.0, %v1834_v37  ;;  %v2969_v49 = vadd.f32 1.0, %v1836_v23  ;;  %v1871_v40 = vld [vmem:[%s2251_s2 + $0x78] sm:$0xff] }
 0x1f2   : > { %v1347_v36 = vmul.f32 %v1867_v43, %v1062_v41  ;;  %v1278_v38 = vadd.f32 %v1830_v13, %v1277_v39  ;;  %v1838_v44 = vpop.eup %1837  ;;  %vm1284_vm11 = vcmp.eq.f32.partialorder %v1283_v27, 8.507059e+37  ;;  %vm1069_vm12 = vweird.f32 %v2929_v12 }
 0x1f3   : > { %1393 = vst [vmem:[%s2414_s12 + $0xd8] sm:$0xff] %v1361_v31  ;;  %v1065_v50 = vmul.f32 %v1838_v44, %v2929_v12  ;;  %v1075_v52 = vand.u32 2147483648, %v2929_v12  ;;  %1843 = vrcp.f32 %v837_v46  ;;  %vm1070_vm13 = vweird.f32 %v1838_v44 }
 0x1f4   : > { %1379 = vst [vmem:[%s2414_s12 + $0x68] sm:$0xff] %v1347_v36  ;;  %v1282_v42 = vsel %vm1281_vm10, %v1830_v13, %v1278_v38  ;;  %v1073_v60 = vand.u32 2147483647, %v2929_v12  ;;  %1845 = vrcp.f32 %v2969_v49  ;;  %vm2980_vm14 = vmor %vm1069_vm12, %vm1070_vm13  ;;  %vm1294_vm0 = vweird.f32 %v2954_v22  ;;  %v1872_v38 = vld [vmem:[%s2251_s2 + $0xf0] sm:$0xff] }
 0x1f5   : > { %v1287_v17 = vsel %vm1284_vm11, %v1286_v45, %v1282_v42  ;;  %v1840_v57 = vpop.eup %1839  ;;  %v1066_v16 = vsub.f32 1.0, %v1065_v50  ;;  %v1076_v1 = vor.u32 1.1754944e-38, %v1075_v52  ;;  %v1298_v20 = vand.u32 2147483647, %v2954_v22  ;;  %v1873_v50 = vld [vmem:[%s2251_s2 + $0xf8] sm:$0xff] }
 0x1f6   : > { %v1362_v59 = vmul.f32 %v1868_v0, %v1287_v17  ;;  %v1842_v61 = vpop.eup %1841  ;;  %v2984_v2 = vadd.f32 1.0, %v1840_v57  ;;  %vm1074_vm15 = vcmp.eq.f32.partialorder %v1073_v60, 8.507059e+37  ;;  %v1300_v62 = vand.u32 2147483648, %v2954_v22 }
 0x1f7   : > { %v1067_v55 = vmul.f32 %v1838_v44, %v1066_v16  ;;  %v1290_v56 = vmul.f32 %v1842_v61, %v2954_v22  ;;  %vm1084_vm1 = vweird.f32 %v837_v46  ;;  %vm1295_vm2 = vweird.f32 %v1842_v61 }
 0x1f8   : > { %1394 = vst [vmem:[%s2414_s12 + $0xe0] sm:$0xff] %v1362_v59  ;;  %1847 = vrcp.f32 %v2984_v2  ;;  %v1088_v8 = vand.u32 2147483647, %v837_v46  ;;  %v1090_v10 = vand.u32 2147483648, %v837_v46  ;;  %vm1296_vm4 = vmor %vm1294_vm0, %vm1295_vm2  ;;  %vm1299_vm5 = vcmp.eq.f32.partialorder %v1298_v20, 8.507059e+37 }
 0x1f9   : > { %v1068_v3 = vadd.f32 %v1838_v44, %v1067_v55  ;;  %v1291_v4 = vsub.f32 1.0, %v1290_v56  ;;  %v1844_v5 = vpop.eup %1843  ;;  %v1301_v14 = vor.u32 1.1754944e-38, %v1300_v62  ;;  %v1313_v51 = vand.u32 2147483647, %v2969_v49 }
 0x1fa   : > { %v1080_v54 = vmul.f32 %v1844_v5, %v837_v46  ;;  %v1846_v58 = vpop.eup %1845  ;;  %vm1085_vm3 = vweird.f32 %v1844_v5  ;;  %v1315_v53 = vand.u32 2147483648, %v2969_v49  ;;  %vm1089_vm7 = vcmp.eq.f32.partialorder %v1088_v8, 8.507059e+37 }
 0x1fb   : > { %v1072_v48 = vsel %vm2980_vm14, %v1838_v44, %v1068_v3  ;;  %v1292_v6 = vmul.f32 %v1842_v61, %v1291_v4  ;;  %v1305_v25 = vmul.f32 %v1846_v58, %v2969_v49  ;;  %vm3001_vm6 = vmor %vm1084_vm1, %vm1085_vm3  ;;  %v1091_v29 = vor.u32 1.1754944e-38, %v1090_v10 }
 0x1fc   : > { %v1077_v7 = vsel %vm1074_vm15, %v1076_v1, %v1072_v48  ;;  %v1081_v15 = vsub.f32 1.0, %v1080_v54  ;;  %vm1310_vm8 = vweird.f32 %v1846_v58  ;;  %vm1309_vm9 = vweird.f32 %v2969_v49 }
 0x1fd   : > { %v1348_v12 = vmul.f32 %v1869_v11, %v1077_v7  ;;  %v1293_v13 = vadd.f32 %v1842_v61, %v1292_v6  ;;  %v1306_v26 = vsub.f32 1.0, %v1305_v25  ;;  %vm1314_vm10 = vcmp.eq.f32.partialorder %v1313_v51, 8.507059e+37  ;;  %vm1311_vm11 = vmor %vm1309_vm9, %vm1310_vm8 }
 0x1fe   : > { %v1082_v9 = vmul.f32 %v1844_v5, %v1081_v15  ;;  %v1848_v19 = vpop.eup %1847  ;;  %v1316_v35 = vor.u32 1.1754944e-38, %v1315_v53  ;;  %v1328_v39 = vand.u32 2147483647, %v2984_v2  ;;  %v1330_v23 = vand.u32 2147483648, %v2984_v2 }
 0x1ff   : > { %1380 = vst [vmem:[%s2414_s12 + $0x70] sm:$0xff] %v1348_v12  ;;  %v1297_v47 = vsel %vm1296_vm4, %v1842_v61, %v1293_v13  ;;  %v1307_v27 = vmul.f32 %v1846_v58, %v1306_v26  ;;  %v1320_v34 = vmul.f32 %v1848_v19, %v2984_v2  ;;  %vm1325_vm12 = vweird.f32 %v1848_v19 }
 0x200   : > { %v1302_v28 = vsel %vm1299_vm5, %v1301_v14, %v1297_v47  ;;  %v1083_v33 = vadd.f32 %v1844_v5, %v1082_v9  ;;  %vm1324_vm13 = vweird.f32 %v2984_v2  ;;  %v1331_v46 = vor.u32 1.1754944e-38, %v1330_v23 }
 0x201   : > { %v1363_v32 = vmul.f32 %v1870_v30, %v1302_v28  ;;  %v1308_v22 = vadd.f32 %v1846_v58, %v1307_v27  ;;  %v1321_v37 = vsub.f32 1.0, %v1320_v34  ;;  %vm1326_vm14 = vmor %vm1324_vm13, %vm1325_vm12  ;;  %vm1329_vm15 = vcmp.eq.f32.partialorder %v1328_v39, 8.507059e+37 }
 0x202   : > { %v1087_v24 = vsel %vm3001_vm6, %v1844_v5, %v1083_v33 }
 0x203   : > { %1395 = vst [vmem:[%s2414_s12 + $0xe8] sm:$0xff] %v1363_v32  ;;  %v1092_v18 = vsel %vm1089_vm7, %v1091_v29, %v1087_v24  ;;  %v1312_v41 = vsel %vm1311_vm11, %v1846_v58, %v1308_v22  ;;  %v1322_v43 = vmul.f32 %v1848_v19, %v1321_v37 }
 0x204   : > { %v1349_v31 = vmul.f32 %v1871_v40, %v1092_v18  ;;  %v1317_v36 = vsel %vm1314_vm10, %v1316_v35, %v1312_v41 }
 0x205   : > { %v1364_v44 = vmul.f32 %v1872_v38, %v1317_v36  ;;  %v1323_v45 = vadd.f32 %v1848_v19, %v1322_v43 }
 0x206   : > { %1381 = vst [vmem:[%s2414_s12 + $0x78] sm:$0xff] %v1349_v31 }
 0x207   : > { %1396 = vst [vmem:[%s2414_s12 + $0xf0] sm:$0xff] %v1364_v44  ;;  %v1327_v49 = vsel %vm1326_vm14, %v1848_v19, %v1323_v45 }
 0x208   : > { %v1332_v42 = vsel %vm1329_vm15, %v1331_v46, %v1327_v49 }
 0x209   : > { %v1365_v17 = vmul.f32 %v1873_v50, %v1332_v42 }
 0x20b   : > { %1397 = vst [vmem:[%s2414_s12 + $0xf8] sm:$0xff] %v1365_v17 }
 0x20c   : > { %2021 = shalt.err (!%p2018_p0)
}
 0x20d   : > { %s2094_s7 = smov 128   ;;  %s2095_s2 = smov 8  }
 0x20e   : > { %1638 = dma.vmem_to_hbm [thread:$0]  (%p2216_p7), %s1414_s13, 4096, %s1416_s18, %s1399_s17, %s2094_s7, %s2094_s7, %s2095_s2  }
 0x20f PF: > { %s3162_s16 = sld [smem:[#allocation16_spill]]  ;;  %p1655_p3 = pnand %p1546_p11, %p2176_p6 }
 0x211   : > { %p1656_p5 = pneg %p1655_p3 }
 0x215   : > { %s1430_s12 = sand.u32 1, %s3162_s16  }
 0x216   : > { %s1431_s14 = scalar_lea.sflag [#allocation4], %s1430_s12 }
 0x217   : > { %2063 = dma.done.wait (%p1656_p5), %s1431_s14, 4096  }
 0x218   : > { %2065 = vsyncadd (%p1656_p5), %s1431_s14, 4294963200  ;;  %s26_s26 = sadd.s32 1, %s2088_s26   ;;  %s3164_s19 = sld [smem:[#allocation19_spill]] }
 0x219   : > { %p23_p9 = scmp.ge.s32.totalorder %s26_s26, 4   ;;  %s3165_s8 = sld [smem:[#allocation18_spill]] }
 0x21a   : > { %s3166_s21 = smov %s2072_s22  ;;  %s3167_s22 = smov %s2076_s23 }
 0x21b   : > { %s3169_s24 = smov %s2084_s25  ;;  %25 = sbr.rel (!%p23_p9) target bundleno = 12 (0xc), region = 110 }
 0x21e   : > { %s3168_s23 = smov %s3164_s19 }
 0x21f   : > { %s3170_s25 = smov %s3165_s8 }
 0x220   :  { %1437 = vsyncpa [#allocation3], 1 }
 0x221   :  { %1439 = vsyncpa [#allocation3 + $0x1], 1 }
 0x222   :  { %1440 = vsyncpa [#allocation6], 1 }
 0x223   :  { %1442 = vsyncpa [#allocation6 + $0x1], 1 }
 0x224   :  { %1443 = vsyncpa [#allocation9], 1 }
 0x225   :  { %1444 = vsyncpa [#allocation4], 1 }
 0x226   :  { %1446 = vsyncpa [#allocation4 + $0x1], 1 }

</bundles_post_ra>
